<compile_context>
chip_gen: v6e
topology: v6e:2x2x1
jax: 0.10.0
libtpu: 0.0.40
codegen_flags: <defaults>
</compile_context>

<pallas_src>
import functools

import jax
import jax.numpy as jnp
from jax import lax
from jax.experimental import pallas as pl
from jax.experimental.pallas import tpu as pltpu


def _pair_sum(v):
    """Group aggregation for 2 channels/group: v[c] + v[partner(c)].

    partner(2g) = 2g+1, partner(2g+1) = 2g.  Two shifted copies (static slices
    + sublane concat) and a parity select -- pure VPU/XLU work, no second MXU
    matmul serialized behind the conv matmul.
    """
    c = v.shape[0]
    down = jnp.concatenate([v[c - 1:c], v[:c - 1]], axis=0)   # down[i] = v[i-1]
    up = jnp.concatenate([v[1:], v[:1]], axis=0)              # up[i]   = v[i+1]
    cidx = lax.broadcasted_iota(jnp.int32, v.shape, 0)
    partner = jnp.where((cidx & 1) == 0, up, down)
    return v + partner


def _conv_gn_kernel(x_ref, w_ref, gamma_ref, beta_ref, out_ref, *,
                    cin, h, w, ksize_h, ksize_w, eps):
    # x_ref:     (B, Cin, H*W)   flat NCHW activations (bitcast in wrapper)
    # w_ref:     (Cout, Cin*KH*KW)  PyTorch OIHW flattening (cin-major k order)
    # gamma_ref: (Cout, 1), beta_ref: (Cout, 1)
    # out_ref:   (B, Cout, OH*OW)   lane-packed, NCHW-flat order
    oh, ow = h - ksize_h + 1, w - ksize_w + 1
    hw = h * w
    kk = ksize_h * ksize_w
    n_grp = 2 * oh * ow                    # elements per group (2 ch/group)
    nb = x_ref.shape[0]

    # ---- in-kernel im2col: lane rolls of the flat image, cin-major rows ----
    rhs_blocks = []
    for b in range(nb):                    # static: nb is 1 or N
        xb = x_ref[b]                      # (Cin, H*W)
        rolled = []
        for ikh in range(ksize_h):
            for ikw in range(ksize_w):
                s = ikh * w + ikw          # rolled[t][c, p] = x[c, p + s_t]
                rolled.append(xb if s == 0 else pltpu.roll(xb, hw - s, axis=1))
        rhs_blocks.append(jnp.concatenate(
            [rolled[t][c:c + 1, :] for c in range(cin) for t in range(kk)],
            axis=0))                       # (K, H*W), row k = c*KK + kh*KW + kw
    rhs = rhs_blocks[0] if nb == 1 else jnp.concatenate(rhs_blocks, axis=1)

    # ---- conv: one lane-dense MXU matmul for the whole batch block ----
    yall = jnp.dot(w_ref[...], rhs,
                   preferred_element_type=jnp.float32)        # (Cout, nb*H*W)

    gamma = gamma_ref[...]                                     # (Cout, 1)
    beta = beta_ref[...]                                       # (Cout, 1)
    for b in range(nb):
        yfull = yall[:, b * hw:(b + 1) * hw]                   # aligned lane slice
        # compact the valid window: stride-W rows -> packed OH*OW lanes
        y = jnp.concatenate(
            [yfull[:, r * w: r * w + ow] for r in range(oh)], axis=1)  # (Cout, OH*OW)

        # ---- GroupNorm: two-pass stats, group values broadcast per channel ----
        csum = jnp.sum(y, axis=1, keepdims=True)               # (Cout, 1)
        mean = _pair_sum(csum) * (1.0 / n_grp)
        d = y - mean
        csq = jnp.sum(d * d, axis=1, keepdims=True)
        var = _pair_sum(csq) * (1.0 / n_grp)                   # biased (PyTorch)
        inv_std = lax.rsqrt(var + eps)

        a = inv_std * gamma                                    # fused FMA epilogue
        out_ref[b] = (d * a + beta).astype(out_ref.dtype)


def _has_multiple_tensorcores():
    # v7x has 2 TensorCores/chip: keep one sample per grid step ("parallel").
    # Single-TC chips (v5e/v6e) fold the batch into one step instead.
    try:
        kind = jax.devices()[0].device_kind.lower()
    except Exception:
        return False
    return ("v7" in kind) or ("7x" in kind)


@functools.partial(jax.jit, static_argnames=("num_groups", "eps", "batch_block"))
def _forward_impl(x_nchw, conv_w, gamma, beta, *, num_groups, eps, batch_block):
    n, cin, h, w = x_nchw.shape
    cout, _, kh, kw = conv_w.shape
    oh, ow = h - kh + 1, w - kw + 1
    p = oh * ow
    k = cin * kh * kw
    assert cout == 2 * num_groups, "pair-sum path assumes 2 channels per group"
    assert n % batch_block == 0

    # All wrapper-side reshapes are trivial row-major bitcasts: nothing but the
    # pallas_call touches HBM.
    xf = x_nchw.reshape(n, cin, h * w).astype(jnp.float32)
    wf = conv_w.reshape(cout, k).astype(jnp.float32)
    gcol = gamma.reshape(cout, 1).astype(jnp.float32)
    bcol = beta.reshape(cout, 1).astype(jnp.float32)

    kernel = functools.partial(_conv_gn_kernel, cin=cin, h=h, w=w,
                               ksize_h=kh, ksize_w=kw, eps=eps)
    bb = batch_block

    out = pl.pallas_call(
        kernel,
        out_shape=jax.ShapeDtypeStruct((n, cout, p), jnp.float32),
        grid=(n // bb,),
        in_specs=[
            pl.BlockSpec((bb, cin, h * w), lambda i: (i, 0, 0)),
            pl.BlockSpec((cout, k), lambda i: (0, 0)),
            pl.BlockSpec((cout, 1), lambda i: (0, 0)),
            pl.BlockSpec((cout, 1), lambda i: (0, 0)),
        ],
        out_specs=pl.BlockSpec((bb, cout, p), lambda i: (i, 0, 0)),
        compiler_params=pltpu.CompilerParams(
            dimension_semantics=("parallel",)),
    )(xf, wf, gcol, bcol)

    # (N, Cout, OH*OW) -> (N, Cout, OH, OW): free reshape, already NCHW order
    return out.reshape(n, cout, oh, ow)


def testnet_forward(x_nchw, conv_w, gamma, beta, num_groups=8, eps=1e-5):
    n = x_nchw.shape[0]
    bb = 1 if (_has_multiple_tensorcores() and n > 1) else n
    return _forward_impl(x_nchw, conv_w, gamma, beta,
                         num_groups=num_groups, eps=eps, batch_block=bb)


def _reference(x_nchw, conv_w, gamma, beta, num_groups=8, eps=1e-5):
    # pure-JAX reference (conv + group norm) for correctness check
    y = lax.conv_general_dilated(
        x_nchw, conv_w, window_strides=(1, 1), padding="VALID",
        dimension_numbers=("NCHW", "OIHW", "NCHW"))
    n, c, oh, ow = y.shape
    yg = y.reshape(n, num_groups, (c // num_groups) * oh * ow)
    mean = yg.mean(axis=-1, keepdims=True)
    var = ((yg - mean) ** 2).mean(axis=-1, keepdims=True)
    yn = ((yg - mean) / jnp.sqrt(var + eps)).reshape(n, c, oh, ow)
    return yn * gamma.reshape(1, c, 1, 1) + beta.reshape(1, c, 1, 1)


if __name__ == "__main__":
    key = jax.random.PRNGKey(0)
    k_x, k_w, k_g, k_b = jax.random.split(key, 4)

    # in_planes=4, out_planes=16 (GroupNorm(8, 16) requires 16 output channels)
    N, Cin, H, W = 2, 4, 16, 16
    Cout = 16

    x = jax.random.normal(k_x, (N, Cin, H, W), dtype=jnp.float32)
    conv_w = jax.random.normal(k_w, (Cout, Cin, 3, 3), dtype=jnp.float32) * 0.1
    gamma = 1.0 + 0.1 * jax.random.normal(k_g, (Cout,), dtype=jnp.float32)
    beta = 0.1 * jax.random.normal(k_b, (Cout,), dtype=jnp.float32)

    out = jax.block_until_ready(testnet_forward(x, conv_w, gamma, beta))
    ref = jax.block_until_ready(_reference(x, conv_w, gamma, beta))

    assert out.shape == (N, Cout, H - 2, W - 2), out.shape
    err = float(jnp.max(jnp.abs(out - ref)))
    assert err < 1e-4, err

    print("KERNEL_OK")
</pallas_src>

<mosaic_0001>
module attributes {stable_mosaic.version = 11 : i64} {
  func.func @_conv_gn_kernel(%arg0: i32, %arg1: memref<2x4x256xf32, #tpu.memory_space<vmem>>, %arg2: memref<16x36xf32, #tpu.memory_space<vmem>>, %arg3: memref<16x1xf32, #tpu.memory_space<vmem>>, %arg4: memref<16x1xf32, #tpu.memory_space<vmem>>, %arg5: memref<2x16x196xf32, #tpu.memory_space<vmem>>) attributes {dimension_semantics = [#tpu.dimension_semantics<parallel>], iteration_bounds = array<i64: 1>, scalar_prefetch = 0 : i64, scratch_operands = 0 : i64, tpu.core_type = #tpu.core_type<tc>, window_params = [{transform_indices = @transform_0, window_bounds = array<i64: 2, 4, 256>}, {pipeline_mode = #tpu.pipeline_mode<synchronous>, transform_indices = @transform_1, window_bounds = array<i64: 16, 36>}, {pipeline_mode = #tpu.pipeline_mode<synchronous>, transform_indices = @transform_2, window_bounds = array<i64: 16, 1>}, {pipeline_mode = #tpu.pipeline_mode<synchronous>, transform_indices = @transform_3, window_bounds = array<i64: 16, 1>}, {transform_indices = @transform_4, window_bounds = array<i64: 2, 16, 196>}]} {
    %c0 = arith.constant 0 : index
    %c0_0 = arith.constant 0 : index
    %c0_1 = arith.constant 0 : index
    %0 = vector.load %arg1[%c0, %c0_0, %c0_1] : memref<2x4x256xf32, #tpu.memory_space<vmem>>, vector<1x4x256xf32>
    %1 = vector.shape_cast %0 : vector<1x4x256xf32> to vector<4x256xf32>
    %c255_i32 = arith.constant 255 : i32
    %2 = tpu.dynamic_rotate %1 by %c255_i32 dim 1 : vector<4x256xf32>, i32 -> vector<4x256xf32>
    %c254_i32 = arith.constant 254 : i32
    %3 = tpu.dynamic_rotate %1 by %c254_i32 dim 1 : vector<4x256xf32>, i32 -> vector<4x256xf32>
    %c240_i32 = arith.constant 240 : i32
    %4 = tpu.dynamic_rotate %1 by %c240_i32 dim 1 : vector<4x256xf32>, i32 -> vector<4x256xf32>
    %c239_i32 = arith.constant 239 : i32
    %5 = tpu.dynamic_rotate %1 by %c239_i32 dim 1 : vector<4x256xf32>, i32 -> vector<4x256xf32>
    %c238_i32 = arith.constant 238 : i32
    %6 = tpu.dynamic_rotate %1 by %c238_i32 dim 1 : vector<4x256xf32>, i32 -> vector<4x256xf32>
    %c224_i32 = arith.constant 224 : i32
    %7 = tpu.dynamic_rotate %1 by %c224_i32 dim 1 : vector<4x256xf32>, i32 -> vector<4x256xf32>
    %c223_i32 = arith.constant 223 : i32
    %8 = tpu.dynamic_rotate %1 by %c223_i32 dim 1 : vector<4x256xf32>, i32 -> vector<4x256xf32>
    %c222_i32 = arith.constant 222 : i32
    %9 = tpu.dynamic_rotate %1 by %c222_i32 dim 1 : vector<4x256xf32>, i32 -> vector<4x256xf32>
    %10 = vector.extract_strided_slice %1 {offsets = [0, 0], sizes = [1, 256], strides = [1, 1]} : vector<4x256xf32> to vector<1x256xf32>
    %11 = vector.extract_strided_slice %2 {offsets = [0, 0], sizes = [1, 256], strides = [1, 1]} : vector<4x256xf32> to vector<1x256xf32>
    %12 = vector.extract_strided_slice %3 {offsets = [0, 0], sizes = [1, 256], strides = [1, 1]} : vector<4x256xf32> to vector<1x256xf32>
    %13 = vector.extract_strided_slice %4 {offsets = [0, 0], sizes = [1, 256], strides = [1, 1]} : vector<4x256xf32> to vector<1x256xf32>
    %14 = vector.extract_strided_slice %5 {offsets = [0, 0], sizes = [1, 256], strides = [1, 1]} : vector<4x256xf32> to vector<1x256xf32>
    %15 = vector.extract_strided_slice %6 {offsets = [0, 0], sizes = [1, 256], strides = [1, 1]} : vector<4x256xf32> to vector<1x256xf32>
    %16 = vector.extract_strided_slice %7 {offsets = [0, 0], sizes = [1, 256], strides = [1, 1]} : vector<4x256xf32> to vector<1x256xf32>
    %17 = vector.extract_strided_slice %8 {offsets = [0, 0], sizes = [1, 256], strides = [1, 1]} : vector<4x256xf32> to vector<1x256xf32>
    %18 = vector.extract_strided_slice %9 {offsets = [0, 0], sizes = [1, 256], strides = [1, 1]} : vector<4x256xf32> to vector<1x256xf32>
    %19 = vector.extract_strided_slice %1 {offsets = [1, 0], sizes = [1, 256], strides = [1, 1]} : vector<4x256xf32> to vector<1x256xf32>
    %20 = vector.extract_strided_slice %2 {offsets = [1, 0], sizes = [1, 256], strides = [1, 1]} : vector<4x256xf32> to vector<1x256xf32>
    %21 = vector.extract_strided_slice %3 {offsets = [1, 0], sizes = [1, 256], strides = [1, 1]} : vector<4x256xf32> to vector<1x256xf32>
    %22 = vector.extract_strided_slice %4 {offsets = [1, 0], sizes = [1, 256], strides = [1, 1]} : vector<4x256xf32> to vector<1x256xf32>
    %23 = vector.extract_strided_slice %5 {offsets = [1, 0], sizes = [1, 256], strides = [1, 1]} : vector<4x256xf32> to vector<1x256xf32>
    %24 = vector.extract_strided_slice %6 {offsets = [1, 0], sizes = [1, 256], strides = [1, 1]} : vector<4x256xf32> to vector<1x256xf32>
    %25 = vector.extract_strided_slice %7 {offsets = [1, 0], sizes = [1, 256], strides = [1, 1]} : vector<4x256xf32> to vector<1x256xf32>
    %26 = vector.extract_strided_slice %8 {offsets = [1, 0], sizes = [1, 256], strides = [1, 1]} : vector<4x256xf32> to vector<1x256xf32>
    %27 = vector.extract_strided_slice %9 {offsets = [1, 0], sizes = [1, 256], strides = [1, 1]} : vector<4x256xf32> to vector<1x256xf32>
    %28 = vector.extract_strided_slice %1 {offsets = [2, 0], sizes = [1, 256], strides = [1, 1]} : vector<4x256xf32> to vector<1x256xf32>
    %29 = vector.extract_strided_slice %2 {offsets = [2, 0], sizes = [1, 256], strides = [1, 1]} : vector<4x256xf32> to vector<1x256xf32>
    %30 = vector.extract_strided_slice %3 {offsets = [2, 0], sizes = [1, 256], strides = [1, 1]} : vector<4x256xf32> to vector<1x256xf32>
    %31 = vector.extract_strided_slice %4 {offsets = [2, 0], sizes = [1, 256], strides = [1, 1]} : vector<4x256xf32> to vector<1x256xf32>
    %32 = vector.extract_strided_slice %5 {offsets = [2, 0], sizes = [1, 256], strides = [1, 1]} : vector<4x256xf32> to vector<1x256xf32>
    %33 = vector.extract_strided_slice %6 {offsets = [2, 0], sizes = [1, 256], strides = [1, 1]} : vector<4x256xf32> to vector<1x256xf32>
    %34 = vector.extract_strided_slice %7 {offsets = [2, 0], sizes = [1, 256], strides = [1, 1]} : vector<4x256xf32> to vector<1x256xf32>
    %35 = vector.extract_strided_slice %8 {offsets = [2, 0], sizes = [1, 256], strides = [1, 1]} : vector<4x256xf32> to vector<1x256xf32>
    %36 = vector.extract_strided_slice %9 {offsets = [2, 0], sizes = [1, 256], strides = [1, 1]} : vector<4x256xf32> to vector<1x256xf32>
    %37 = vector.extract_strided_slice %1 {offsets = [3, 0], sizes = [1, 256], strides = [1, 1]} : vector<4x256xf32> to vector<1x256xf32>
    %38 = vector.extract_strided_slice %2 {offsets = [3, 0], sizes = [1, 256], strides = [1, 1]} : vector<4x256xf32> to vector<1x256xf32>
    %39 = vector.extract_strided_slice %3 {offsets = [3, 0], sizes = [1, 256], strides = [1, 1]} : vector<4x256xf32> to vector<1x256xf32>
    %40 = vector.extract_strided_slice %4 {offsets = [3, 0], sizes = [1, 256], strides = [1, 1]} : vector<4x256xf32> to vector<1x256xf32>
    %41 = vector.extract_strided_slice %5 {offsets = [3, 0], sizes = [1, 256], strides = [1, 1]} : vector<4x256xf32> to vector<1x256xf32>
    %42 = vector.extract_strided_slice %6 {offsets = [3, 0], sizes = [1, 256], strides = [1, 1]} : vector<4x256xf32> to vector<1x256xf32>
    %43 = vector.extract_strided_slice %7 {offsets = [3, 0], sizes = [1, 256], strides = [1, 1]} : vector<4x256xf32> to vector<1x256xf32>
    %44 = vector.extract_strided_slice %8 {offsets = [3, 0], sizes = [1, 256], strides = [1, 1]} : vector<4x256xf32> to vector<1x256xf32>
    %45 = vector.extract_strided_slice %9 {offsets = [3, 0], sizes = [1, 256], strides = [1, 1]} : vector<4x256xf32> to vector<1x256xf32>
    %46 = tpu.concatenate %10, %11, %12, %13, %14, %15, %16, %17, %18, %19, %20, %21, %22, %23, %24, %25 in 0 : vector<1x256xf32>, vector<1x256xf32>, vector<1x256xf32>, vector<1x256xf32>, vector<1x256xf32>, vector<1x256xf32>, vector<1x256xf32>, vector<1x256xf32>, vector<1x256xf32>, vector<1x256xf32>, vector<1x256xf32>, vector<1x256xf32>, vector<1x256xf32>, vector<1x256xf32>, vector<1x256xf32>, vector<1x256xf32> -> vector<16x256xf32>
    %47 = tpu.concatenate %26, %27, %28, %29, %30, %31, %32, %33, %34, %35, %36, %37, %38, %39, %40, %41 in 0 : vector<1x256xf32>, vector<1x256xf32>, vector<1x256xf32>, vector<1x256xf32>, vector<1x256xf32>, vector<1x256xf32>, vector<1x256xf32>, vector<1x256xf32>, vector<1x256xf32>, vector<1x256xf32>, vector<1x256xf32>, vector<1x256xf32>, vector<1x256xf32>, vector<1x256xf32>, vector<1x256xf32>, vector<1x256xf32> -> vector<16x256xf32>
    %48 = tpu.concatenate %42, %43, %44, %45 in 0 : vector<1x256xf32>, vector<1x256xf32>, vector<1x256xf32>, vector<1x256xf32> -> vector<4x256xf32>
    %49 = tpu.concatenate %46, %47, %48 in 0 : vector<16x256xf32>, vector<16x256xf32>, vector<4x256xf32> -> vector<36x256xf32>
    %c1 = arith.constant 1 : index
    %c0_2 = arith.constant 0 : index
    %c0_3 = arith.constant 0 : index
    %50 = vector.load %arg1[%c1, %c0_2, %c0_3] : memref<2x4x256xf32, #tpu.memory_space<vmem>>, vector<1x4x256xf32>
    %51 = vector.shape_cast %50 : vector<1x4x256xf32> to vector<4x256xf32>
    %c255_i32_4 = arith.constant 255 : i32
    %52 = tpu.dynamic_rotate %51 by %c255_i32_4 dim 1 : vector<4x256xf32>, i32 -> vector<4x256xf32>
    %c254_i32_5 = arith.constant 254 : i32
    %53 = tpu.dynamic_rotate %51 by %c254_i32_5 dim 1 : vector<4x256xf32>, i32 -> vector<4x256xf32>
    %c240_i32_6 = arith.constant 240 : i32
    %54 = tpu.dynamic_rotate %51 by %c240_i32_6 dim 1 : vector<4x256xf32>, i32 -> vector<4x256xf32>
    %c239_i32_7 = arith.constant 239 : i32
    %55 = tpu.dynamic_rotate %51 by %c239_i32_7 dim 1 : vector<4x256xf32>, i32 -> vector<4x256xf32>
    %c238_i32_8 = arith.constant 238 : i32
    %56 = tpu.dynamic_rotate %51 by %c238_i32_8 dim 1 : vector<4x256xf32>, i32 -> vector<4x256xf32>
    %c224_i32_9 = arith.constant 224 : i32
    %57 = tpu.dynamic_rotate %51 by %c224_i32_9 dim 1 : vector<4x256xf32>, i32 -> vector<4x256xf32>
    %c223_i32_10 = arith.constant 223 : i32
    %58 = tpu.dynamic_rotate %51 by %c223_i32_10 dim 1 : vector<4x256xf32>, i32 -> vector<4x256xf32>
    %c222_i32_11 = arith.constant 222 : i32
    %59 = tpu.dynamic_rotate %51 by %c222_i32_11 dim 1 : vector<4x256xf32>, i32 -> vector<4x256xf32>
    %60 = vector.extract_strided_slice %51 {offsets = [0, 0], sizes = [1, 256], strides = [1, 1]} : vector<4x256xf32> to vector<1x256xf32>
    %61 = vector.extract_strided_slice %52 {offsets = [0, 0], sizes = [1, 256], strides = [1, 1]} : vector<4x256xf32> to vector<1x256xf32>
    %62 = vector.extract_strided_slice %53 {offsets = [0, 0], sizes = [1, 256], strides = [1, 1]} : vector<4x256xf32> to vector<1x256xf32>
    %63 = vector.extract_strided_slice %54 {offsets = [0, 0], sizes = [1, 256], strides = [1, 1]} : vector<4x256xf32> to vector<1x256xf32>
    %64 = vector.extract_strided_slice %55 {offsets = [0, 0], sizes = [1, 256], strides = [1, 1]} : vector<4x256xf32> to vector<1x256xf32>
    %65 = vector.extract_strided_slice %56 {offsets = [0, 0], sizes = [1, 256], strides = [1, 1]} : vector<4x256xf32> to vector<1x256xf32>
    %66 = vector.extract_strided_slice %57 {offsets = [0, 0], sizes = [1, 256], strides = [1, 1]} : vector<4x256xf32> to vector<1x256xf32>
    %67 = vector.extract_strided_slice %58 {offsets = [0, 0], sizes = [1, 256], strides = [1, 1]} : vector<4x256xf32> to vector<1x256xf32>
    %68 = vector.extract_strided_slice %59 {offsets = [0, 0], sizes = [1, 256], strides = [1, 1]} : vector<4x256xf32> to vector<1x256xf32>
    %69 = vector.extract_strided_slice %51 {offsets = [1, 0], sizes = [1, 256], strides = [1, 1]} : vector<4x256xf32> to vector<1x256xf32>
    %70 = vector.extract_strided_slice %52 {offsets = [1, 0], sizes = [1, 256], strides = [1, 1]} : vector<4x256xf32> to vector<1x256xf32>
    %71 = vector.extract_strided_slice %53 {offsets = [1, 0], sizes = [1, 256], strides = [1, 1]} : vector<4x256xf32> to vector<1x256xf32>
    %72 = vector.extract_strided_slice %54 {offsets = [1, 0], sizes = [1, 256], strides = [1, 1]} : vector<4x256xf32> to vector<1x256xf32>
    %73 = vector.extract_strided_slice %55 {offsets = [1, 0], sizes = [1, 256], strides = [1, 1]} : vector<4x256xf32> to vector<1x256xf32>
    %74 = vector.extract_strided_slice %56 {offsets = [1, 0], sizes = [1, 256], strides = [1, 1]} : vector<4x256xf32> to vector<1x256xf32>
    %75 = vector.extract_strided_slice %57 {offsets = [1, 0], sizes = [1, 256], strides = [1, 1]} : vector<4x256xf32> to vector<1x256xf32>
    %76 = vector.extract_strided_slice %58 {offsets = [1, 0], sizes = [1, 256], strides = [1, 1]} : vector<4x256xf32> to vector<1x256xf32>
    %77 = vector.extract_strided_slice %59 {offsets = [1, 0], sizes = [1, 256], strides = [1, 1]} : vector<4x256xf32> to vector<1x256xf32>
    %78 = vector.extract_strided_slice %51 {offsets = [2, 0], sizes = [1, 256], strides = [1, 1]} : vector<4x256xf32> to vector<1x256xf32>
    %79 = vector.extract_strided_slice %52 {offsets = [2, 0], sizes = [1, 256], strides = [1, 1]} : vector<4x256xf32> to vector<1x256xf32>
    %80 = vector.extract_strided_slice %53 {offsets = [2, 0], sizes = [1, 256], strides = [1, 1]} : vector<4x256xf32> to vector<1x256xf32>
    %81 = vector.extract_strided_slice %54 {offsets = [2, 0], sizes = [1, 256], strides = [1, 1]} : vector<4x256xf32> to vector<1x256xf32>
    %82 = vector.extract_strided_slice %55 {offsets = [2, 0], sizes = [1, 256], strides = [1, 1]} : vector<4x256xf32> to vector<1x256xf32>
    %83 = vector.extract_strided_slice %56 {offsets = [2, 0], sizes = [1, 256], strides = [1, 1]} : vector<4x256xf32> to vector<1x256xf32>
    %84 = vector.extract_strided_slice %57 {offsets = [2, 0], sizes = [1, 256], strides = [1, 1]} : vector<4x256xf32> to vector<1x256xf32>
    %85 = vector.extract_strided_slice %58 {offsets = [2, 0], sizes = [1, 256], strides = [1, 1]} : vector<4x256xf32> to vector<1x256xf32>
    %86 = vector.extract_strided_slice %59 {offsets = [2, 0], sizes = [1, 256], strides = [1, 1]} : vector<4x256xf32> to vector<1x256xf32>
    %87 = vector.extract_strided_slice %51 {offsets = [3, 0], sizes = [1, 256], strides = [1, 1]} : vector<4x256xf32> to vector<1x256xf32>
    %88 = vector.extract_strided_slice %52 {offsets = [3, 0], sizes = [1, 256], strides = [1, 1]} : vector<4x256xf32> to vector<1x256xf32>
    %89 = vector.extract_strided_slice %53 {offsets = [3, 0], sizes = [1, 256], strides = [1, 1]} : vector<4x256xf32> to vector<1x256xf32>
    %90 = vector.extract_strided_slice %54 {offsets = [3, 0], sizes = [1, 256], strides = [1, 1]} : vector<4x256xf32> to vector<1x256xf32>
    %91 = vector.extract_strided_slice %55 {offsets = [3, 0], sizes = [1, 256], strides = [1, 1]} : vector<4x256xf32> to vector<1x256xf32>
    %92 = vector.extract_strided_slice %56 {offsets = [3, 0], sizes = [1, 256], strides = [1, 1]} : vector<4x256xf32> to vector<1x256xf32>
    %93 = vector.extract_strided_slice %57 {offsets = [3, 0], sizes = [1, 256], strides = [1, 1]} : vector<4x256xf32> to vector<1x256xf32>
    %94 = vector.extract_strided_slice %58 {offsets = [3, 0], sizes = [1, 256], strides = [1, 1]} : vector<4x256xf32> to vector<1x256xf32>
    %95 = vector.extract_strided_slice %59 {offsets = [3, 0], sizes = [1, 256], strides = [1, 1]} : vector<4x256xf32> to vector<1x256xf32>
    %96 = tpu.concatenate %60, %61, %62, %63, %64, %65, %66, %67, %68, %69, %70, %71, %72, %73, %74, %75 in 0 : vector<1x256xf32>, vector<1x256xf32>, vector<1x256xf32>, vector<1x256xf32>, vector<1x256xf32>, vector<1x256xf32>, vector<1x256xf32>, vector<1x256xf32>, vector<1x256xf32>, vector<1x256xf32>, vector<1x256xf32>, vector<1x256xf32>, vector<1x256xf32>, vector<1x256xf32>, vector<1x256xf32>, vector<1x256xf32> -> vector<16x256xf32>
    %97 = tpu.concatenate %76, %77, %78, %79, %80, %81, %82, %83, %84, %85, %86, %87, %88, %89, %90, %91 in 0 : vector<1x256xf32>, vector<1x256xf32>, vector<1x256xf32>, vector<1x256xf32>, vector<1x256xf32>, vector<1x256xf32>, vector<1x256xf32>, vector<1x256xf32>, vector<1x256xf32>, vector<1x256xf32>, vector<1x256xf32>, vector<1x256xf32>, vector<1x256xf32>, vector<1x256xf32>, vector<1x256xf32>, vector<1x256xf32> -> vector<16x256xf32>
    %98 = tpu.concatenate %92, %93, %94, %95 in 0 : vector<1x256xf32>, vector<1x256xf32>, vector<1x256xf32>, vector<1x256xf32> -> vector<4x256xf32>
    %99 = tpu.concatenate %96, %97, %98 in 0 : vector<16x256xf32>, vector<16x256xf32>, vector<4x256xf32> -> vector<36x256xf32>
    %100 = tpu.concatenate %49, %99 in 1 : vector<36x256xf32>, vector<36x256xf32> -> vector<36x512xf32>
    %c0_12 = arith.constant 0 : index
    %c0_13 = arith.constant 0 : index
    %101 = vector.load %arg2[%c0_12, %c0_13] : memref<16x36xf32, #tpu.memory_space<vmem>>, vector<16x36xf32>
    %cst = arith.constant dense<0.000000e+00> : vector<16x512xf32>
    %102 = tpu.matmul %101, %100, %cst {dimension_numbers = #tpu.dot_dimension_numbers<[1], [0], [0], [1], [0, 0, 1, 1], [], []>} : vector<16x36xf32>, vector<36x512xf32>, vector<16x512xf32> -> vector<16x512xf32>
    %c0_14 = arith.constant 0 : index
    %c0_15 = arith.constant 0 : index
    %103 = vector.load %arg3[%c0_14, %c0_15] : memref<16x1xf32, #tpu.memory_space<vmem>>, vector<16x1xf32>
    %c0_16 = arith.constant 0 : index
    %c0_17 = arith.constant 0 : index
    %104 = vector.load %arg4[%c0_16, %c0_17] : memref<16x1xf32, #tpu.memory_space<vmem>>, vector<16x1xf32>
    %105 = vector.extract_strided_slice %102 {offsets = [0, 0], sizes = [16, 256], strides = [1, 1]} : vector<16x512xf32> to vector<16x256xf32>
    %106 = vector.extract_strided_slice %105 {offsets = [0, 0], sizes = [16, 14], strides = [1, 1]} : vector<16x256xf32> to vector<16x14xf32>
    %107 = vector.extract_strided_slice %105 {offsets = [0, 16], sizes = [16, 14], strides = [1, 1]} : vector<16x256xf32> to vector<16x14xf32>
    %108 = vector.extract_strided_slice %105 {offsets = [0, 32], sizes = [16, 14], strides = [1, 1]} : vector<16x256xf32> to vector<16x14xf32>
    %109 = vector.extract_strided_slice %105 {offsets = [0, 48], sizes = [16, 14], strides = [1, 1]} : vector<16x256xf32> to vector<16x14xf32>
    %110 = vector.extract_strided_slice %105 {offsets = [0, 64], sizes = [16, 14], strides = [1, 1]} : vector<16x256xf32> to vector<16x14xf32>
    %111 = vector.extract_strided_slice %105 {offsets = [0, 80], sizes = [16, 14], strides = [1, 1]} : vector<16x256xf32> to vector<16x14xf32>
    %112 = vector.extract_strided_slice %105 {offsets = [0, 96], sizes = [16, 14], strides = [1, 1]} : vector<16x256xf32> to vector<16x14xf32>
    %113 = vector.extract_strided_slice %105 {offsets = [0, 112], sizes = [16, 14], strides = [1, 1]} : vector<16x256xf32> to vector<16x14xf32>
    %114 = vector.extract_strided_slice %105 {offsets = [0, 128], sizes = [16, 14], strides = [1, 1]} : vector<16x256xf32> to vector<16x14xf32>
    %115 = vector.extract_strided_slice %105 {offsets = [0, 144], sizes = [16, 14], strides = [1, 1]} : vector<16x256xf32> to vector<16x14xf32>
    %116 = vector.extract_strided_slice %105 {offsets = [0, 160], sizes = [16, 14], strides = [1, 1]} : vector<16x256xf32> to vector<16x14xf32>
    %117 = vector.extract_strided_slice %105 {offsets = [0, 176], sizes = [16, 14], strides = [1, 1]} : vector<16x256xf32> to vector<16x14xf32>
    %118 = vector.extract_strided_slice %105 {offsets = [0, 192], sizes = [16, 14], strides = [1, 1]} : vector<16x256xf32> to vector<16x14xf32>
    %119 = vector.extract_strided_slice %105 {offsets = [0, 208], sizes = [16, 14], strides = [1, 1]} : vector<16x256xf32> to vector<16x14xf32>
    %120 = tpu.concatenate %106, %107, %108, %109, %110, %111, %112, %113, %114, %115, %116, %117, %118, %119 in 1 : vector<16x14xf32>, vector<16x14xf32>, vector<16x14xf32>, vector<16x14xf32>, vector<16x14xf32>, vector<16x14xf32>, vector<16x14xf32>, vector<16x14xf32>, vector<16x14xf32>, vector<16x14xf32>, vector<16x14xf32>, vector<16x14xf32>, vector<16x14xf32>, vector<16x14xf32> -> vector<16x196xf32>
    %cst_18 = arith.constant dense<0.000000e+00> : vector<16xf32>
    %121 = vector.multi_reduction <add>, %120, %cst_18 [1] : vector<16x196xf32> to vector<16xf32>
    %122 = vector.shape_cast %121 : vector<16xf32> to vector<16x1xf32>
    %123 = vector.extract_strided_slice %122 {offsets = [15, 0], sizes = [1, 1], strides = [1, 1]} : vector<16x1xf32> to vector<1x1xf32>
    %124 = vector.extract_strided_slice %122 {offsets = [0, 0], sizes = [15, 1], strides = [1, 1]} : vector<16x1xf32> to vector<15x1xf32>
    %125 = tpu.concatenate %123, %124 in 0 : vector<1x1xf32>, vector<15x1xf32> -> vector<16x1xf32>
    %126 = vector.extract_strided_slice %122 {offsets = [1, 0], sizes = [15, 1], strides = [1, 1]} : vector<16x1xf32> to vector<15x1xf32>
    %127 = vector.extract_strided_slice %122 {offsets = [0, 0], sizes = [1, 1], strides = [1, 1]} : vector<16x1xf32> to vector<1x1xf32>
    %128 = tpu.concatenate %126, %127 in 0 : vector<15x1xf32>, vector<1x1xf32> -> vector<16x1xf32>
    %129 = tpu.iota {dimensions = array<i32: 0>} : vector<16x1xi32>
    %c1_i32 = arith.constant 1 : i32
    %130 = vector.broadcast %c1_i32 : i32 to vector<16x1xi32>
    %131 = arith.andi %129, %130 : vector<16x1xi32>
    %c0_i32 = arith.constant 0 : i32
    %132 = vector.broadcast %c0_i32 : i32 to vector<16x1xi32>
    %133 = arith.cmpi eq, %131, %132 : vector<16x1xi32>
    %134 = arith.select %133, %128, %125 : vector<16x1xi1>, vector<16x1xf32>
    %135 = arith.addf %122, %134 : vector<16x1xf32>
    %cst_19 = arith.constant 0.00255102036 : f32
    %136 = vector.broadcast %cst_19 : f32 to vector<16x1xf32>
    %137 = arith.mulf %135, %136 : vector<16x1xf32>
    %138 = vector.broadcast %137 : vector<16x1xf32> to vector<16x196xf32>
    %139 = arith.subf %120, %138 : vector<16x196xf32>
    %140 = arith.mulf %139, %139 : vector<16x196xf32>
    %cst_20 = arith.constant dense<0.000000e+00> : vector<16xf32>
    %141 = vector.multi_reduction <add>, %140, %cst_20 [1] : vector<16x196xf32> to vector<16xf32>
    %142 = vector.shape_cast %141 : vector<16xf32> to vector<16x1xf32>
    %143 = vector.extract_strided_slice %142 {offsets = [15, 0], sizes = [1, 1], strides = [1, 1]} : vector<16x1xf32> to vector<1x1xf32>
    %144 = vector.extract_strided_slice %142 {offsets = [0, 0], sizes = [15, 1], strides = [1, 1]} : vector<16x1xf32> to vector<15x1xf32>
    %145 = tpu.concatenate %143, %144 in 0 : vector<1x1xf32>, vector<15x1xf32> -> vector<16x1xf32>
    %146 = vector.extract_strided_slice %142 {offsets = [1, 0], sizes = [15, 1], strides = [1, 1]} : vector<16x1xf32> to vector<15x1xf32>
    %147 = vector.extract_strided_slice %142 {offsets = [0, 0], sizes = [1, 1], strides = [1, 1]} : vector<16x1xf32> to vector<1x1xf32>
    %148 = tpu.concatenate %146, %147 in 0 : vector<15x1xf32>, vector<1x1xf32> -> vector<16x1xf32>
    %149 = tpu.iota {dimensions = array<i32: 0>} : vector<16x1xi32>
    %c1_i32_21 = arith.constant 1 : i32
    %150 = vector.broadcast %c1_i32_21 : i32 to vector<16x1xi32>
    %151 = arith.andi %149, %150 : vector<16x1xi32>
    %c0_i32_22 = arith.constant 0 : i32
    %152 = vector.broadcast %c0_i32_22 : i32 to vector<16x1xi32>
    %153 = arith.cmpi eq, %151, %152 : vector<16x1xi32>
    %154 = arith.select %153, %148, %145 : vector<16x1xi1>, vector<16x1xf32>
    %155 = arith.addf %142, %154 : vector<16x1xf32>
    %cst_23 = arith.constant 0.00255102036 : f32
    %156 = vector.broadcast %cst_23 : f32 to vector<16x1xf32>
    %157 = arith.mulf %155, %156 : vector<16x1xf32>
    %cst_24 = arith.constant 9.99999974E-6 : f32
    %158 = vector.broadcast %cst_24 : f32 to vector<16x1xf32>
    %159 = arith.addf %157, %158 : vector<16x1xf32>
    %160 = math.rsqrt %159 : vector<16x1xf32>
    %161 = arith.mulf %160, %103 : vector<16x1xf32>
    %162 = vector.broadcast %161 : vector<16x1xf32> to vector<16x196xf32>
    %163 = arith.mulf %139, %162 : vector<16x196xf32>
    %164 = vector.broadcast %104 : vector<16x1xf32> to vector<16x196xf32>
    %165 = arith.addf %163, %164 : vector<16x196xf32>
    %c0_25 = arith.constant 0 : index
    %c0_26 = arith.constant 0 : index
    %c0_27 = arith.constant 0 : index
    %166 = vector.load %arg5[%c0_25, %c0_26, %c0_27] : memref<2x16x196xf32, #tpu.memory_space<vmem>>, vector<1x16x196xf32>
    %167 = vector.shape_cast %166 : vector<1x16x196xf32> to vector<16x196xf32>
    %168 = vector.shape_cast %165 : vector<16x196xf32> to vector<1x16x196xf32>
    tpu.vector_store %arg5[%c0_25, %c0_26, %c0_27], %168 {strides = array<i32>} : memref<2x16x196xf32, #tpu.memory_space<vmem>>, vector<1x16x196xf32>,
    %169 = vector.extract_strided_slice %102 {offsets = [0, 256], sizes = [16, 256], strides = [1, 1]} : vector<16x512xf32> to vector<16x256xf32>
    %170 = vector.extract_strided_slice %169 {offsets = [0, 0], sizes = [16, 14], strides = [1, 1]} : vector<16x256xf32> to vector<16x14xf32>
    %171 = vector.extract_strided_slice %169 {offsets = [0, 16], sizes = [16, 14], strides = [1, 1]} : vector<16x256xf32> to vector<16x14xf32>
    %172 = vector.extract_strided_slice %169 {offsets = [0, 32], sizes = [16, 14], strides = [1, 1]} : vector<16x256xf32> to vector<16x14xf32>
    %173 = vector.extract_strided_slice %169 {offsets = [0, 48], sizes = [16, 14], strides = [1, 1]} : vector<16x256xf32> to vector<16x14xf32>
    %174 = vector.extract_strided_slice %169 {offsets = [0, 64], sizes = [16, 14], strides = [1, 1]} : vector<16x256xf32> to vector<16x14xf32>
    %175 = vector.extract_strided_slice %169 {offsets = [0, 80], sizes = [16, 14], strides = [1, 1]} : vector<16x256xf32> to vector<16x14xf32>
    %176 = vector.extract_strided_slice %169 {offsets = [0, 96], sizes = [16, 14], strides = [1, 1]} : vector<16x256xf32> to vector<16x14xf32>
    %177 = vector.extract_strided_slice %169 {offsets = [0, 112], sizes = [16, 14], strides = [1, 1]} : vector<16x256xf32> to vector<16x14xf32>
    %178 = vector.extract_strided_slice %169 {offsets = [0, 128], sizes = [16, 14], strides = [1, 1]} : vector<16x256xf32> to vector<16x14xf32>
    %179 = vector.extract_strided_slice %169 {offsets = [0, 144], sizes = [16, 14], strides = [1, 1]} : vector<16x256xf32> to vector<16x14xf32>
    %180 = vector.extract_strided_slice %169 {offsets = [0, 160], sizes = [16, 14], strides = [1, 1]} : vector<16x256xf32> to vector<16x14xf32>
    %181 = vector.extract_strided_slice %169 {offsets = [0, 176], sizes = [16, 14], strides = [1, 1]} : vector<16x256xf32> to vector<16x14xf32>
    %182 = vector.extract_strided_slice %169 {offsets = [0, 192], sizes = [16, 14], strides = [1, 1]} : vector<16x256xf32> to vector<16x14xf32>
    %183 = vector.extract_strided_slice %169 {offsets = [0, 208], sizes = [16, 14], strides = [1, 1]} : vector<16x256xf32> to vector<16x14xf32>
    %184 = tpu.concatenate %170, %171, %172, %173, %174, %175, %176, %177, %178, %179, %180, %181, %182, %183 in 1 : vector<16x14xf32>, vector<16x14xf32>, vector<16x14xf32>, vector<16x14xf32>, vector<16x14xf32>, vector<16x14xf32>, vector<16x14xf32>, vector<16x14xf32>, vector<16x14xf32>, vector<16x14xf32>, vector<16x14xf32>, vector<16x14xf32>, vector<16x14xf32>, vector<16x14xf32> -> vector<16x196xf32>
    %cst_28 = arith.constant dense<0.000000e+00> : vector<16xf32>
    %185 = vector.multi_reduction <add>, %184, %cst_28 [1] : vector<16x196xf32> to vector<16xf32>
    %186 = vector.shape_cast %185 : vector<16xf32> to vector<16x1xf32>
    %187 = vector.extract_strided_slice %186 {offsets = [15, 0], sizes = [1, 1], strides = [1, 1]} : vector<16x1xf32> to vector<1x1xf32>
    %188 = vector.extract_strided_slice %186 {offsets = [0, 0], sizes = [15, 1], strides = [1, 1]} : vector<16x1xf32> to vector<15x1xf32>
    %189 = tpu.concatenate %187, %188 in 0 : vector<1x1xf32>, vector<15x1xf32> -> vector<16x1xf32>
    %190 = vector.extract_strided_slice %186 {offsets = [1, 0], sizes = [15, 1], strides = [1, 1]} : vector<16x1xf32> to vector<15x1xf32>
    %191 = vector.extract_strided_slice %186 {offsets = [0, 0], sizes = [1, 1], strides = [1, 1]} : vector<16x1xf32> to vector<1x1xf32>
    %192 = tpu.concatenate %190, %191 in 0 : vector<15x1xf32>, vector<1x1xf32> -> vector<16x1xf32>
    %193 = tpu.iota {dimensions = array<i32: 0>} : vector<16x1xi32>
    %c1_i32_29 = arith.constant 1 : i32
    %194 = vector.broadcast %c1_i32_29 : i32 to vector<16x1xi32>
    %195 = arith.andi %193, %194 : vector<16x1xi32>
    %c0_i32_30 = arith.constant 0 : i32
    %196 = vector.broadcast %c0_i32_30 : i32 to vector<16x1xi32>
    %197 = arith.cmpi eq, %195, %196 : vector<16x1xi32>
    %198 = arith.select %197, %192, %189 : vector<16x1xi1>, vector<16x1xf32>
    %199 = arith.addf %186, %198 : vector<16x1xf32>
    %cst_31 = arith.constant 0.00255102036 : f32
    %200 = vector.broadcast %cst_31 : f32 to vector<16x1xf32>
    %201 = arith.mulf %199, %200 : vector<16x1xf32>
    %202 = vector.broadcast %201 : vector<16x1xf32> to vector<16x196xf32>
    %203 = arith.subf %184, %202 : vector<16x196xf32>
    %204 = arith.mulf %203, %203 : vector<16x196xf32>
    %cst_32 = arith.constant dense<0.000000e+00> : vector<16xf32>
    %205 = vector.multi_reduction <add>, %204, %cst_32 [1] : vector<16x196xf32> to vector<16xf32>
    %206 = vector.shape_cast %205 : vector<16xf32> to vector<16x1xf32>
    %207 = vector.extract_strided_slice %206 {offsets = [15, 0], sizes = [1, 1], strides = [1, 1]} : vector<16x1xf32> to vector<1x1xf32>
    %208 = vector.extract_strided_slice %206 {offsets = [0, 0], sizes = [15, 1], strides = [1, 1]} : vector<16x1xf32> to vector<15x1xf32>
    %209 = tpu.concatenate %207, %208 in 0 : vector<1x1xf32>, vector<15x1xf32> -> vector<16x1xf32>
    %210 = vector.extract_strided_slice %206 {offsets = [1, 0], sizes = [15, 1], strides = [1, 1]} : vector<16x1xf32> to vector<15x1xf32>
    %211 = vector.extract_strided_slice %206 {offsets = [0, 0], sizes = [1, 1], strides = [1, 1]} : vector<16x1xf32> to vector<1x1xf32>
    %212 = tpu.concatenate %210, %211 in 0 : vector<15x1xf32>, vector<1x1xf32> -> vector<16x1xf32>
    %213 = tpu.iota {dimensions = array<i32: 0>} : vector<16x1xi32>
    %c1_i32_33 = arith.constant 1 : i32
    %214 = vector.broadcast %c1_i32_33 : i32 to vector<16x1xi32>
    %215 = arith.andi %213, %214 : vector<16x1xi32>
    %c0_i32_34 = arith.constant 0 : i32
    %216 = vector.broadcast %c0_i32_34 : i32 to vector<16x1xi32>
    %217 = arith.cmpi eq, %215, %216 : vector<16x1xi32>
    %218 = arith.select %217, %212, %209 : vector<16x1xi1>, vector<16x1xf32>
    %219 = arith.addf %206, %218 : vector<16x1xf32>
    %cst_35 = arith.constant 0.00255102036 : f32
    %220 = vector.broadcast %cst_35 : f32 to vector<16x1xf32>
    %221 = arith.mulf %219, %220 : vector<16x1xf32>
    %cst_36 = arith.constant 9.99999974E-6 : f32
    %222 = vector.broadcast %cst_36 : f32 to vector<16x1xf32>
    %223 = arith.addf %221, %222 : vector<16x1xf32>
    %224 = math.rsqrt %223 : vector<16x1xf32>
    %225 = arith.mulf %224, %103 : vector<16x1xf32>
    %226 = vector.broadcast %225 : vector<16x1xf32> to vector<16x196xf32>
    %227 = arith.mulf %203, %226 : vector<16x196xf32>
    %228 = vector.broadcast %104 : vector<16x1xf32> to vector<16x196xf32>
    %229 = arith.addf %227, %228 : vector<16x196xf32>
    %c1_37 = arith.constant 1 : index
    %c0_38 = arith.constant 0 : index
    %c0_39 = arith.constant 0 : index
    %230 = vector.load %arg5[%c1_37, %c0_38, %c0_39] : memref<2x16x196xf32, #tpu.memory_space<vmem>>, vector<1x16x196xf32>
    %231 = vector.shape_cast %230 : vector<1x16x196xf32> to vector<16x196xf32>
    %232 = vector.shape_cast %229 : vector<16x196xf32> to vector<1x16x196xf32>
    tpu.vector_store %arg5[%c1_37, %c0_38, %c0_39], %232 {strides = array<i32>} : memref<2x16x196xf32, #tpu.memory_space<vmem>>, vector<1x16x196xf32>,
    return
  }
  func.func @transform_0(%arg0: i32) -> (i32, i32, i32) {
    %c0_i32 = arith.constant 0 : i32
    %c0_i32_0 = arith.constant 0 : i32
    %c0_i32_1 = arith.constant 0 : i32
    return %arg0, %c0_i32, %c0_i32_0 : i32, i32, i32
  }
  func.func @transform_1(%arg0: i32) -> (i32, i32) {
    %c0_i32 = arith.constant 0 : i32
    %c0_i32_0 = arith.constant 0 : i32
    %c0_i32_1 = arith.constant 0 : i32
    return %c0_i32, %c0_i32_0 : i32, i32
  }
  func.func @transform_2(%arg0: i32) -> (i32, i32) {
    %c0_i32 = arith.constant 0 : i32
    %c0_i32_0 = arith.constant 0 : i32
    %c0_i32_1 = arith.constant 0 : i32
    return %c0_i32, %c0_i32_0 : i32, i32
  }
  func.func @transform_3(%arg0: i32) -> (i32, i32) {
    %c0_i32 = arith.constant 0 : i32
    %c0_i32_0 = arith.constant 0 : i32
    %c0_i32_1 = arith.constant 0 : i32
    return %c0_i32, %c0_i32_0 : i32, i32
  }
  func.func @transform_4(%arg0: i32) -> (i32, i32, i32) {
    %c0_i32 = arith.constant 0 : i32
    %c0_i32_0 = arith.constant 0 : i32
    %c0_i32_1 = arith.constant 0 : i32
    return %arg0, %c0_i32, %c0_i32_0 : i32, i32, i32
  }
}

</mosaic_0001>

<bundles_post_ra>
// kernel: _forward_impl.1
= control target key start
LH: loop header
LB: loop body
LE: loop exit
PB: predicated region body
PF: predicated region fallthrough
CT: control target
= control target key end

     0   :  { %s1115_s17 = smov 95   ;;  %s1116_s18 = smov 96   ;;  %v1123_v4 = vmov 0.0   ;;  %v25_v11 = vlaneseq  ;;  %vm141_vm4 = vcmask 1040384   ;;  %vm144_vm6 = vcmask 1041408   ;;  %s1838_s0 = inlined_call_operand.vmem [shape: f32[2,4,256], index: 0, kind: input, shape index: {}]   ;;  %s1839_s1 = inlined_call_operand.vmem [shape: f32[16,36], index: 1, kind: input, shape index: {}]   ;;  %s1840_s2 = inlined_call_operand.vmem [shape: f32[16,1], index: 2, kind: input, shape index: {}]   ;;  %s1841_s3 = inlined_call_operand.vmem [shape: f32[16,1], index: 3, kind: input, shape index: {}]   ;;  %s1842_s4 = inlined_call_operand.vmem [shape: f32[2,16,196], index: 4, kind: output, shape index: {}]  }
   0x1   :  { %v1163_v0 = vld [vmem:[%s1838_s0] sm:$0xff]  ;;  %v1172_v2 = vld [vmem:[%s1838_s0 + $0x8] sm:$0xff]  ;;  %s1117_s21 = smov 110   ;;  %s1118_s0 = smov 127   ;;  %512 = vmatprep.mubr.f32.mxu0 %v1123_v4  ;;  %589 = vmatprep.mubr.f32.mxu1 %v1123_v4  ;;  %vm147_vm7 = vcmask 1042432   ;;  %vm150_vm8 = vcmask 1043456  }
   0x2   :  { %65 = vrot.lane.b32.xlu1 %v1163_v0, %s1115_s17  ;;  %58 = vrot.lane.b32.xlu0 %v1163_v0, %s1116_s18  ;;  %v19_v1 = vcombine.high %v1163_v0, %v1163_v0  ;;  %v233_v3 = vcombine.high %v1172_v2, %v1172_v2  ;;  %s1119_s22 = smov 94   ;;  %s1120_s23 = smov 126   ;;  %v1204_v12 = vshrl.u32 %v25_v11, 7  ;;  %v1206_v15 = vand.u32 127, %v25_v11 }
   0x3   :  { %s1121_s24 = smov 112   ;;  %s1122_s25 = smov 111   ;;  %vm153_vm11 = vcmask 1044480   ;;  %vm156_vm12 = vcmask 1045504   ;;  %vm159_vm14 = vcmask 1046528   ;;  %vm429_vm15 = vcmask 293888  }
   0x4   :  { %v81_v18 = vsub.s32 0, %v1204_v12  ;;  %v85_v19 = vsub.s32 4, %v1204_v12  ;;  %v133_v20 = vsub.s32 1, %v1204_v12  ;;  %v137_v21 = vsub.s32 5, %v1204_v12  ;;  %s1125_s30 = smov 122   ;;  %s1126_s5 = smov 120  }
   0x5   :  { %v178_v22 = vsub.s32 2, %v1204_v12  ;;  %v182_v23 = vsub.s32 6, %v1204_v12  ;;  %v188_v24 = vsub.s32 3, %v1204_v12  ;;  %v192_v25 = vsub.s32 7, %v1204_v12  ;;  %s1127_s6 = smov 118   ;;  %s1128_s7 = smov 116  }
   0x6   :  { %67 = vrot.lane.b32.xlu1 %v19_v1, %s1115_s17  ;;  %60 = vrot.lane.b32.xlu0 %v19_v1, %s1116_s18  ;;  %vm69_vm0 = vcmp.lt.s32.totalorder %v1206_v15, 95  ;;  %vm62_vm1 = vcmp.lt.s32.totalorder %v1206_v15, 96  ;;  %vm55_vm2 = vcmp.lt.s32.totalorder %v1206_v15, 110  ;;  %vm27_vm3 = vcmp.lt.s32.totalorder %v1206_v15, 127  ;;  %s1129_s8 = smov 114   ;;  %s1130_s9 = smov 108  }
   0x7   :  { %v1221_v28 = vrot.slane %v1163_v0, %v81_v18  ;;  %v1224_v29 = vrot.slane %v1163_v0, %v85_v19  ;;  %vm76_vm5 = vcmp.lt.s32.totalorder %v1206_v15, 94  ;;  %v1228_v30 = vrot.slane %v1163_v0, %v133_v20  ;;  %s1131_s10 = smov 106   ;;  %s1132_s11 = smov 104  }
   0x8   :  { %v1231_v31 = vrot.slane %v1163_v0, %v137_v21  ;;  %v1234_v32 = vrot.slane %v1163_v0, %v178_v22  ;;  %v1237_v33 = vrot.slane %v1163_v0, %v182_v23  ;;  %v1244_v36 = vrot.slane %v1163_v0, %v188_v24  ;;  %s1133_s12 = smov 102  }
   0x9   :  { %v1249_v37 = vrot.slane %v1163_v0, %v192_v25  ;;  %v1252_v38 = vrot.slane %v1172_v2, %v81_v18  ;;  %v1255_v39 = vrot.slane %v1172_v2, %v85_v19  ;;  %v1258_v40 = vrot.slane %v1172_v2, %v133_v20 }
   0xa   :  { %267 = vrot.lane.b32.xlu1 %v233_v3, %s1116_s18  ;;  %265 = vrot.lane.b32.xlu0 %v1172_v2, %s1116_s18  ;;  %v1265_v45 = vrot.slane %v1172_v2, %v137_v21  ;;  %v1268_v46 = vrot.slane %v1172_v2, %v178_v22  ;;  %v1283_v53 = vrot.slane %v1172_v2, %v182_v23  ;;  %vm34_vm9 = vcmp.lt.s32.totalorder %v1206_v15, 126 }
   0xb   :  { %v1286_v54 = vrot.slane %v1172_v2, %v188_v24  ;;  %vm41_vm10 = vcmp.lt.s32.totalorder %v1206_v15, 112  ;;  %vm48_vm13 = vcmp.lt.s32.totalorder %v1206_v15, 111 }
   0xe   :  { %273 = vrot.lane.b32.xlu1 %v233_v3, %s1115_s17  ;;  %271 = vrot.lane.b32.xlu0 %v1172_v2, %s1115_s17 }
  0x12   :  { %53 = vrot.lane.b32.xlu1 %v19_v1, %s1117_s21  ;;  %51 = vrot.lane.b32.xlu0 %v1163_v0, %s1117_s21 }
  0x16   :  { %261 = vrot.lane.b32.xlu1 %v233_v3, %s1117_s21  ;;  %259 = vrot.lane.b32.xlu0 %v1172_v2, %s1117_s21 }
  0x1a   :  { %23 = vrot.lane.b32.xlu1 %v19_v1, %s1118_s0  ;;  %21 = vrot.lane.b32.xlu0 %v1163_v0, %s1118_s0 }
  0x1e   :  { %74 = vrot.lane.b32.xlu1 %v19_v1, %s1119_s22  ;;  %72 = vrot.lane.b32.xlu0 %v1163_v0, %s1119_s22 }
  0x22   :  { %237 = vrot.lane.b32.xlu1 %v233_v3, %s1118_s0  ;;  %235 = vrot.lane.b32.xlu0 %v1172_v2, %s1118_s0 }
  0x26   :  { %279 = vrot.lane.b32.xlu1 %v233_v3, %s1119_s22  ;;  %277 = vrot.lane.b32.xlu0 %v1172_v2, %s1119_s22 }
  0x2a   :  { %32 = vrot.lane.b32.xlu1 %v19_v1, %s1120_s23  ;;  %30 = vrot.lane.b32.xlu0 %v1163_v0, %s1120_s23 }
  0x2e   :  { %243 = vrot.lane.b32.xlu1 %v233_v3, %s1120_s23  ;;  %241 = vrot.lane.b32.xlu0 %v1172_v2, %s1120_s23 }
  0x32   :  { %39 = vrot.lane.b32.xlu1 %v19_v1, %s1121_s24  ;;  %37 = vrot.lane.b32.xlu0 %v1163_v0, %s1121_s24 }
  0x36   :  { %249 = vrot.lane.b32.xlu1 %v233_v3, %s1121_s24  ;;  %247 = vrot.lane.b32.xlu0 %v1172_v2, %s1121_s24 }
  0x3a   :  { %46 = vrot.lane.b32.xlu1 %v19_v1, %s1122_s25  ;;  %44 = vrot.lane.b32.xlu0 %v1163_v0, %s1122_s25 }
  0x3e   :  { %255 = vrot.lane.b32.xlu1 %v233_v3, %s1122_s25  ;;  %253 = vrot.lane.b32.xlu0 %v1172_v2, %s1122_s25 }
  0x74   :  { %v66_v5 = vpop.permute.xlu1 %65  ;;  %v59_v6 = vpop.permute.xlu0 %58 }
  0x78   :  { %v68_v7 = vpop.permute.xlu1 %67  ;;  %v61_v8 = vpop.permute.xlu0 %60 }
  0x79   :  { %v63_v41 = vsel %vm62_vm1, %v59_v6, %v61_v8  ;;  %v64_v42 = vsel %vm62_vm1, %v61_v8, %v59_v6  ;;  %v70_v51 = vsel %vm69_vm0, %v66_v5, %v68_v7  ;;  %v71_v52 = vsel %vm69_vm0, %v68_v7, %v66_v5 }
  0x7a   :  { %v1288_v55 = vrot.slane %v63_v41, 2  ;;  %v1290_v56 = vrot.slane %v64_v42, 2  ;;  %v1304_v1 = vrot.slane %v70_v51, 1  ;;  %v1306_v3 = vrot.slane %v71_v52, 1 }
  0x7c   :  { %v268_v9 = vpop.permute.xlu1 %267  ;;  %v266_v10 = vpop.permute.xlu0 %265  ;;  %v211_v41 = vsel %vm141_vm4, %v1290_v56, %v1306_v3 }
  0x7d   :  { %v269_v57 = vsel %vm62_vm1, %v266_v10, %v268_v9  ;;  %v270_v58 = vsel %vm62_vm1, %v268_v9, %v266_v10  ;;  %vm691_vm1 = vcmask 228352  }
  0x7e   :  { %v1314_v7 = vrot.slane %v269_v57, 2  ;;  %v1316_v8 = vrot.slane %v270_v58, 2 }
  0x80   :  { %v274_v13 = vpop.permute.xlu1 %273  ;;  %v272_v14 = vpop.permute.xlu0 %271 }
  0x81   :  { %v275_v59 = vsel %vm69_vm0, %v272_v14, %v274_v13  ;;  %v276_v60 = vsel %vm69_vm0, %v274_v13, %v272_v14  ;;  %vm688_vm0 = vcmask 113664  }
  0x82   :  { %v1322_v11 = vrot.slane %v275_v59, 1  ;;  %v1324_v13 = vrot.slane %v276_v60, 1 }
  0x84   :  { %v54_v16 = vpop.permute.xlu1 %53  ;;  %v52_v17 = vpop.permute.xlu0 %51 }
  0x85   :  { %v56_v34 = vsel %vm55_vm2, %v52_v17, %v54_v16  ;;  %v57_v35 = vsel %vm55_vm2, %v54_v16, %v52_v17 }
  0x86   :  { %v1270_v47 = vrot.slane %v56_v34, 3  ;;  %v1272_v48 = vrot.slane %v57_v35, 3  ;;  %v210_v35 = vsel %vm141_vm4, %v1288_v55, %v1304_v1 }
  0x88   :  { %v262_v26 = vpop.permute.xlu1 %261  ;;  %v260_v27 = vpop.permute.xlu0 %259  ;;  %v225_v5 = vsel %vm141_vm4, %v1272_v48, %v1290_v56  ;;  %v224_v6 = vsel %vm141_vm4, %v1270_v47, %v1288_v55 }
  0x89   :  { %v263_v49 = vsel %vm55_vm2, %v260_v27, %v262_v26  ;;  %v264_v50 = vsel %vm55_vm2, %v262_v26, %v260_v27  ;;  %v227_v17 = vsel %vm144_vm6, %v225_v5, %v1306_v3  ;;  %v226_v19 = vsel %vm144_vm6, %v224_v6, %v1304_v1 }
  0x8a   :  { %v1300_v61 = vrot.slane %v263_v49, 3  ;;  %v1302_v62 = vrot.slane %v264_v50, 3  ;;  %v390_v26 = vrot.slane %v1172_v2, %v192_v25  ;;  %v407_v2 = vsel %vm141_vm4, %v1314_v7, %v1322_v11 }
  0x8b   :  { %v408_v25 = vsel %vm141_vm4, %v1316_v8, %v1324_v13  ;;  %vm694_vm2 = vcmask 343040  }
  0x8c   :  { %v24_v43 = vpop.permute.xlu1 %23  ;;  %v22_v44 = vpop.permute.xlu0 %21  ;;  %v422_v21 = vsel %vm141_vm4, %v1302_v62, %v1316_v8  ;;  %v421_v22 = vsel %vm141_vm4, %v1300_v61, %v1314_v7 }
  0x8d   :  { %v28_v14 = vsel %vm27_vm3, %v22_v44, %v24_v43  ;;  %v29_v16 = vsel %vm27_vm3, %v24_v43, %v22_v44  ;;  %v424_v42 = vsel %vm144_vm6, %v422_v21, %v1324_v13  ;;  %v423_v43 = vsel %vm144_vm6, %v421_v22, %v1322_v11 }
  0x8e   :  { %v91_v27 = vrot.slane %v28_v14, 7  ;;  %v92_v34 = vrot.slane %v29_v16, 7 }
  0x90   :  { %v75_v63 = vpop.permute.xlu1 %74  ;;  %v73_v0 = vpop.permute.xlu0 %72 }
  0x91   :  { %v77_v9 = vsel %vm76_vm5, %v73_v0, %v75_v63  ;;  %v78_v10 = vsel %vm76_vm5, %v75_v63, %v73_v0  ;;  %v143_v63 = vsel %vm141_vm4, %v1224_v29, %v92_v34 }
  0x92   :  { %v229_v23 = vsel %vm147_vm7, %v227_v17, %v78_v10  ;;  %v228_v24 = vsel %vm147_vm7, %v226_v19, %v77_v9  ;;  %v162_v44 = vsel %vm141_vm4, %v77_v9, %v1228_v30  ;;  %v163_v49 = vsel %vm141_vm4, %v78_v10, %v1231_v31 }
  0x93   :  { %1071 = vmatprep.subr.msk.mxu0 %vm150_vm8, %v229_v23  ;;  %v196_v50 = vsel %vm141_vm4, %v1304_v1, %v77_v9  ;;  %v197_v51 = vsel %vm141_vm4, %v1306_v3, %v78_v10  ;;  %v212_v58 = vsel %vm144_vm6, %v210_v35, %v77_v9  ;;  %v213_v59 = vsel %vm144_vm6, %v211_v41, %v78_v10 }
  0x94   :  { %v238_v18 = vpop.permute.xlu1 %237  ;;  %v236_v20 = vpop.permute.xlu0 %235  ;;  %1072 = vmatpush1.msk.msra.mxu0 %vm150_vm8, %v228_v24  ;;  %v142_v31 = vsel %vm141_vm4, %v1221_v28, %v91_v27  ;;  %v164_v6 = vsel %vm144_vm6, %v162_v44, %v91_v27  ;;  %v165_v9 = vsel %vm144_vm6, %v163_v49, %v92_v34  ;;  %v198_v10 = vsel %vm144_vm6, %v196_v50, %v1234_v32 }
  0x95   :  { %v239_v60 = vsel %vm27_vm3, %v236_v20, %v238_v18  ;;  %v240_v30 = vsel %vm27_vm3, %v238_v18, %v236_v20  ;;  %v199_v14 = vsel %vm144_vm6, %v197_v51, %v1237_v33  ;;  %v214_v28 = vsel %vm147_vm7, %v212_v58, %v1244_v36 }
  0x96   :  { %v215_v29 = vsel %vm147_vm7, %v213_v59, %v1249_v37  ;;  %v295_v16 = vrot.slane %v239_v60, 7  ;;  %v296_v17 = vrot.slane %v240_v30, 7  ;;  %v200_v24 = vsel %vm147_vm7, %v198_v10, %v91_v27 }
  0x97   :  { %v201_v35 = vsel %vm147_vm7, %v199_v14, %v92_v34  ;;  %v217_v41 = vsel %vm150_vm8, %v215_v29, %v92_v34  ;;  %vm697_vm3 = vcmask 457728  }
  0x98   :  { %v280_v52 = vpop.permute.xlu1 %279  ;;  %v278_v57 = vpop.permute.xlu0 %277 }
  0x99   :  { %v281_v0 = vsel %vm76_vm5, %v278_v57, %v280_v52  ;;  %v282_v5 = vsel %vm76_vm5, %v280_v52, %v278_v57  ;;  %vm700_vm5 = vcmask 572416  }
  0x9a   :  { %v393_v20 = vsel %vm141_vm4, %v1322_v11, %v281_v0  ;;  %v394_v32 = vsel %vm141_vm4, %v1324_v13, %v282_v5  ;;  %v426_v33 = vsel %vm147_vm7, %v424_v42, %v282_v5  ;;  %v425_v21 = vsel %vm147_vm7, %v423_v43, %v281_v0 }
  0x9b   :  { %v409_v22 = vsel %vm144_vm6, %v407_v2, %v281_v0  ;;  %v410_v36 = vsel %vm144_vm6, %v408_v25, %v282_v5  ;;  %1075 = vmatprep.subr.msk.mxu1 %vm150_vm8, %v426_v33  ;;  %v216_v2 = vsel %vm150_vm8, %v214_v28, %v91_v27  ;;  %v359_v25 = vsel %vm141_vm4, %v281_v0, %v1258_v40 }
  0x9c   :  { %v33_v18 = vpop.permute.xlu1 %32  ;;  %v31_v19 = vpop.permute.xlu0 %30  ;;  %1076 = vmatpush1.msk.msra.mxu1 %vm150_vm8, %v425_v21  ;;  %v360_v42 = vsel %vm141_vm4, %v282_v5, %v1265_v45  ;;  %v395_v43 = vsel %vm144_vm6, %v393_v20, %v1268_v46  ;;  %v396_v44 = vsel %vm144_vm6, %v394_v32, %v1283_v53  ;;  %v411_v34 = vsel %vm147_vm7, %v409_v22, %v1286_v54 }
  0x9d   :  { %v35_v37 = vsel %vm34_vm9, %v31_v19, %v33_v18  ;;  %v36_v23 = vsel %vm34_vm9, %v33_v18, %v31_v19  ;;  %v412_v27 = vsel %vm147_vm7, %v410_v36, %v390_v26  ;;  %v345_v40 = vsel %vm141_vm4, %v1252_v38, %v295_v16 }
  0x9e   :  { %v97_v51 = vrot.slane %v35_v37, 6  ;;  %v98_v52 = vrot.slane %v36_v23, 6  ;;  %v346_v45 = vsel %vm141_vm4, %v1255_v39, %v296_v17  ;;  %v361_v54 = vsel %vm144_vm6, %v359_v25, %v295_v16 }
  0x9f   :  { %v362_v26 = vsel %vm144_vm6, %v360_v42, %v296_v17  ;;  %v397_v57 = vsel %vm147_vm7, %v395_v43, %v295_v16  ;;  %v398_v58 = vsel %vm147_vm7, %v396_v44, %v296_v17  ;;  %v414_v30 = vsel %vm150_vm8, %v412_v27, %v296_v17 }
  0xa0   :  { %v244_v49 = vpop.permute.xlu1 %243  ;;  %v242_v50 = vpop.permute.xlu0 %241  ;;  %v413_v0 = vsel %vm150_vm8, %v411_v34, %v295_v16  ;;  %v145_v5 = vsel %vm144_vm6, %v142_v31, %v97_v51  ;;  %v146_v10 = vsel %vm144_vm6, %v143_v63, %v98_v52  ;;  %v166_v14 = vsel %vm147_vm7, %v164_v6, %v97_v51 }
  0xa1   :  { %v245_v46 = vsel %vm34_vm9, %v242_v50, %v244_v49  ;;  %v246_v53 = vsel %vm34_vm9, %v244_v49, %v242_v50  ;;  %v167_v28 = vsel %vm147_vm7, %v165_v9, %v98_v52  ;;  %v219_v19 = vsel %vm153_vm11, %v217_v41, %v98_v52 }
  0xa2   :  { %v301_v38 = vrot.slane %v245_v46, 6  ;;  %v302_v59 = vrot.slane %v246_v53, 6  ;;  %v218_v17 = vsel %vm153_vm11, %v216_v2, %v97_v51  ;;  %v203_v31 = vsel %vm150_vm8, %v201_v35, %v98_v52 }
  0xa3   :  { %v202_v63 = vsel %vm150_vm8, %v200_v24, %v97_v51  ;;  %vm718_vm9 = vcmask 211968  }
  0xa4   :  { %v40_v60 = vpop.permute.xlu1 %39  ;;  %v38_v39 = vpop.permute.xlu0 %37  ;;  %v347_v6 = vsel %vm144_vm6, %v345_v40, %v301_v38  ;;  %v348_v9 = vsel %vm144_vm6, %v346_v45, %v302_v59  ;;  %v363_v32 = vsel %vm147_vm7, %v361_v54, %v301_v38  ;;  %v364_v33 = vsel %vm147_vm7, %v362_v26, %v302_v59 }
  0xa5   :  { %v42_v29 = vsel %vm41_vm10, %v38_v39, %v40_v60  ;;  %v43_v18 = vsel %vm41_vm10, %v40_v60, %v38_v39  ;;  %v416_v23 = vsel %vm153_vm11, %v414_v30, %v302_v59  ;;  %v415_v24 = vsel %vm153_vm11, %v413_v0, %v301_v38 }
  0xa6   :  { %v103_v16 = vrot.slane %v42_v29, 5  ;;  %v104_v20 = vrot.slane %v43_v18, 5  ;;  %v400_v2 = vsel %vm150_vm8, %v398_v58, %v302_v59  ;;  %v399_v25 = vsel %vm150_vm8, %v397_v57, %v301_v38 }
  0xa7   :  { %vm703_vm6 = vcmask 687104  }
  0xa8   :  { %v250_v21 = vpop.permute.xlu1 %249  ;;  %v248_v22 = vpop.permute.xlu0 %247  ;;  %v148_v42 = vsel %vm147_vm7, %v145_v5, %v103_v16  ;;  %v149_v43 = vsel %vm147_vm7, %v146_v10, %v104_v20  ;;  %v221_v44 = vsel %vm156_vm12, %v219_v19, %v104_v20  ;;  %v220_v49 = vsel %vm156_vm12, %v218_v17, %v103_v16 }
  0xa9   :  { %v251_v36 = vsel %vm41_vm10, %v248_v22, %v250_v21  ;;  %v252_v37 = vsel %vm41_vm10, %v250_v21, %v248_v22  ;;  %v205_v27 = vsel %vm153_vm11, %v203_v31, %v104_v20  ;;  %v204_v51 = vsel %vm153_vm11, %v202_v63, %v103_v16 }
  0xaa   :  { %v307_v35 = vrot.slane %v251_v36, 5  ;;  %v308_v41 = vrot.slane %v252_v37, 5  ;;  %v169_v52 = vsel %vm150_vm8, %v167_v28, %v104_v20  ;;  %v168_v40 = vsel %vm150_vm8, %v166_v14, %v103_v16 }
  0xab   :  { %vm709_vm10 = vcmask 916480  }
  0xac   :  { %v47_v50 = vpop.permute.xlu1 %46  ;;  %v45_v34 = vpop.permute.xlu0 %44  ;;  %v1474_v45 = vsel %vm147_vm7, %v347_v6, %v307_v35  ;;  %v350_v46 = vsel %vm147_vm7, %v348_v9, %v308_v41  ;;  %v418_v58 = vsel %vm156_vm12, %v416_v23, %v308_v41  ;;  %v417_v38 = vsel %vm156_vm12, %v415_v24, %v307_v35 }
  0xad   :  { %v49_v53 = vsel %vm48_vm13, %v45_v34, %v47_v50  ;;  %v50_v54 = vsel %vm48_vm13, %v47_v50, %v45_v34  ;;  %v402_v59 = vsel %vm153_vm11, %v400_v2, %v308_v41  ;;  %v401_v60 = vsel %vm153_vm11, %v399_v25, %v307_v35 }
  0xae   :  { %v109_v26 = vrot.slane %v49_v53, 4  ;;  %v110_v57 = vrot.slane %v50_v54, 4  ;;  %v366_v39 = vsel %vm150_vm8, %v364_v33, %v308_v41  ;;  %v365_v30 = vsel %vm150_vm8, %v363_v32, %v307_v35 }
  0xaf   :  { %vm706_vm7 = vcmask 801792  }
  0xb0   :  { %v256_v0 = vpop.permute.xlu1 %255  ;;  %v254_v5 = vpop.permute.xlu0 %253  ;;  %v223_v10 = vsel %vm159_vm14, %v221_v44, %v110_v57  ;;  %v222_v14 = vsel %vm159_vm14, %v220_v49, %v109_v26  ;;  %v207_v28 = vsel %vm156_vm12, %v205_v27, %v110_v57  ;;  %v206_v29 = vsel %vm156_vm12, %v204_v51, %v109_v26 }
  0xb1   :  { %v257_v18 = vsel %vm48_vm13, %v254_v5, %v256_v0  ;;  %v258_v19 = vsel %vm48_vm13, %v256_v0, %v254_v5  ;;  %472 = vmatprep.subr.mxu0 %v223_v10  ;;  %v209_v17 = vsel %vm159_vm14, %v207_v28, %v1272_v48  ;;  %v208_v16 = vsel %vm159_vm14, %v206_v29, %v1270_v47 }
  0xb2   :  { %v313_v20 = vrot.slane %v257_v18, 4  ;;  %v314_v31 = vrot.slane %v258_v19, 4  ;;  %473 = vmatpush1.msra.mxu0 %v222_v14  ;;  %v171_v63 = vsel %vm153_vm11, %v169_v52, %v110_v57  ;;  %v170_v6 = vsel %vm153_vm11, %v168_v40, %v109_v26 }
  0xb3   :  { %474 = vmatprep.subr.mxu0 %v209_v17  ;;  %v173_v9 = vsel %vm156_vm12, %v171_v63, %v1272_v48  ;;  %v172_v15 = vsel %vm156_vm12, %v170_v6, %v1270_v47  ;;  %v152_v32 = vsel %vm150_vm8, %v149_v43, %v110_v57  ;;  %v151_v33 = vsel %vm150_vm8, %v148_v42, %v109_v26 }
  0xb4   :  { %475 = vmatpush1.msra.mxu0 %v208_v16  ;;  %v175_v21 = vsel %vm159_vm14, %v173_v9, %v1290_v56  ;;  %v420_v22 = vsel %vm159_vm14, %v418_v58, %v314_v31  ;;  %v174_v36 = vsel %vm159_vm14, %v172_v15, %v1288_v55  ;;  %v419_v37 = vsel %vm159_vm14, %v417_v38, %v313_v20 }
  0xb5   :  { %476 = vmatprep.subr.mxu0 %v175_v21  ;;  %549 = vmatprep.subr.mxu1 %v420_v22  ;;  %v155_v23 = vsel %vm153_vm11, %v152_v32, %v1272_v48  ;;  %v404_v24 = vsel %vm156_vm12, %v402_v59, %v314_v31  ;;  %v154_v35 = vsel %vm153_vm11, %v151_v33, %v1270_v47  ;;  %vm712_vm13 = vcmask 1031168  }
  0xb6   :  { %477 = vmatpush1.msra.mxu0 %v174_v36  ;;  %550 = vmatpush1.msra.mxu1 %v419_v37  ;;  %v158_v41 = vsel %vm156_vm12, %v155_v23, %v1290_v56  ;;  %v406_v2 = vsel %vm159_vm14, %v404_v24, %v1302_v62  ;;  %v157_v25 = vsel %vm156_vm12, %v154_v35, %v1288_v55  ;;  %v427_v56 = vld [vmem:[%s1839_s1] sm:$0xff] }
  0xb7   :  { %v161_v48 = vsel %vm159_vm14, %v158_v41, %v1306_v3  ;;  %551 = vmatprep.subr.mxu1 %v406_v2  ;;  %v160_v42 = vsel %vm159_vm14, %v157_v25, %v1304_v1  ;;  %v403_v47 = vsel %vm156_vm12, %v401_v60, %v313_v20  ;;  %v368_v43 = vsel %vm153_vm11, %v366_v39, %v314_v31 }
  0xb8   :  { %478 = vmatprep.subr.mxu0 %v161_v48  ;;  %v405_v55 = vsel %vm159_vm14, %v403_v47, %v1300_v61  ;;  %v370_v44 = vsel %vm156_vm12, %v368_v43, %v1302_v62  ;;  %v367_v3 = vsel %vm153_vm11, %v365_v30, %v313_v20  ;;  %v352_v49 = vsel %vm150_vm8, %v350_v46, %v314_v31  ;;  %v428_v46 = vld [vmem:[%s1839_s1 + $0x8] sm:$0xff]  ;;  %s1124_s1 = smov 124  }
  0xb9   :  { %479 = vmatpush1.msra.mxu0 %v160_v42  ;;  %552 = vmatpush1.msra.mxu1 %v405_v55  ;;  %v372_v1 = vsel %vm159_vm14, %v370_v44, %v1316_v8  ;;  %v369_v50 = vsel %vm156_vm12, %v367_v3, %v1300_v61  ;;  %v354_v34 = vsel %vm153_vm11, %v352_v49, %v1302_v62 }
  0xba   :  { %1073 = vmatmul.mubr.msk.f32.vlgmr.msra.gmra.mxu0 %vm429_vm15, %v427_v56  ;;  %553 = vmatprep.subr.mxu1 %v372_v1  ;;  %v371_v27 = vsel %vm159_vm14, %v369_v50, %v1314_v7  ;;  %v356_v51 = vsel %vm156_vm12, %v354_v34, %v1316_v8  ;;  %v351_v52 = vsel %vm150_vm8, %v1474_v45, %v313_v20  ;;  %vm715_vm8 = vcmask 97280  }
  0xbb   :  { %554 = vmatpush1.msra.mxu1 %v371_v27  ;;  %v358_v40 = vsel %vm159_vm14, %v356_v51, %v1324_v13  ;;  %518 = vmatprep.mubr.f32.mxu0 %v1123_v4  ;;  %v353_v62 = vsel %vm153_vm11, %v351_v52, %v1300_v61  ;;  %vm721_vm11 = vcmask 326656  }
  0xbc   :  { %555 = vmatprep.subr.mxu1 %v358_v40  ;;  %v355_v8 = vsel %vm156_vm12, %v353_v62, %v1314_v7  ;;  %vm724_vm12 = vcmask 441344  }
  0xbd   :  { %v357_v45 = vsel %vm159_vm14, %v355_v8, %v1322_v11 }
  0xbe   :  { %556 = vmatpush1.msra.mxu1 %v357_v45  ;;  %1074 = vmatmul.mubr.msk.f32.gmra.mxu0 %vm429_vm15, %v428_v46 }
  0xbf   :  { %1077 = vmatmul.mubr.msk.f32.vlgmr.msra.gmra.mxu1 %vm429_vm15, %v427_v56 }
  0xc0   :  { %595 = vmatprep.mubr.f32.mxu1 %v1123_v4 }
  0xc3   :  { %1078 = vmatmul.mubr.msk.f32.gmra.mxu1 %vm429_vm15, %v428_v46  ;;  %vm727_vm15 = vcmask 556032  }
 0x17a   :  { %v1568_v61 = vpop.f32.mrf.mxu0 }
 0x17b   :  { %608 = vrot.lane.b32.xlu0 %v1568_v61, %s1120_s23 }
 0x17c   :  { %v516_v13 = vpop.f32.mrf.mxu0 }
 0x17e   :  { %v1572_v53 = vpop.f32.mrf.mxu0 }
 0x17f   :  { %v1574_v7 = vpop.f32.mrf.mxu1  ;;  %610 = vrot.lane.b32.xlu1 %v1572_v53, %s1120_s23 }
 0x180   :  { %853 = vrot.lane.b32.xlu0 %v1574_v7, %s1120_s23  ;;  %v522_v54 = vpop.f32.mrf.mxu0 }
 0x181   :  { %v593_v11 = vpop.f32.mrf.mxu1 }
 0x183   :  { %v1580_v4 = vpop.f32.mrf.mxu1 }
 0x184   :  { %614 = vrot.lane.b32.xlu0 %v1568_v61, %s1124_s1  ;;  %855 = vrot.lane.b32.xlu1 %v1580_v4, %s1120_s23 }
 0x185   :  { %v599_v26 = vpop.f32.mrf.mxu1 }
 0x188   :  { %859 = vrot.lane.b32.xlu0 %v1574_v7, %s1124_s1  ;;  %616 = vrot.lane.b32.xlu1 %v1572_v53, %s1124_s1 }
 0x18c   :  { %620 = vrot.lane.b32.xlu0 %v1568_v61, %s1125_s30  ;;  %861 = vrot.lane.b32.xlu1 %v1580_v4, %s1124_s1 }
 0x190   :  { %865 = vrot.lane.b32.xlu0 %v1574_v7, %s1125_s30  ;;  %622 = vrot.lane.b32.xlu1 %v1572_v53, %s1125_s30 }
 0x194   :  { %626 = vrot.lane.b32.xlu0 %v1568_v61, %s1126_s5  ;;  %867 = vrot.lane.b32.xlu1 %v1580_v4, %s1125_s30 }
 0x198   :  { %871 = vrot.lane.b32.xlu0 %v1574_v7, %s1126_s5  ;;  %628 = vrot.lane.b32.xlu1 %v1572_v53, %s1126_s5 }
 0x19c   :  { %632 = vrot.lane.b32.xlu0 %v1568_v61, %s1127_s6  ;;  %873 = vrot.lane.b32.xlu1 %v1580_v4, %s1126_s5 }
 0x1a0   :  { %877 = vrot.lane.b32.xlu0 %v1574_v7, %s1127_s6  ;;  %634 = vrot.lane.b32.xlu1 %v1572_v53, %s1127_s6 }
 0x1a4   :  { %638 = vrot.lane.b32.xlu0 %v1568_v61, %s1128_s7  ;;  %879 = vrot.lane.b32.xlu1 %v1580_v4, %s1127_s6 }
 0x1a8   :  { %883 = vrot.lane.b32.xlu0 %v1574_v7, %s1128_s7  ;;  %640 = vrot.lane.b32.xlu1 %v1572_v53, %s1128_s7 }
 0x1ac   :  { %644 = vrot.lane.b32.xlu0 %v1568_v61, %s1129_s8  ;;  %885 = vrot.lane.b32.xlu1 %v1580_v4, %s1128_s7 }
 0x1b0   :  { %889 = vrot.lane.b32.xlu0 %v1574_v7, %s1129_s8  ;;  %646 = vrot.lane.b32.xlu1 %v1572_v53, %s1129_s8 }
 0x1b4   :  { %658 = vrot.lane.b32.xlu0 %v516_v13, %s1117_s21  ;;  %891 = vrot.lane.b32.xlu1 %v1580_v4, %s1129_s8 }
 0x1b8   :  { %664 = vrot.lane.b32.xlu0 %v516_v13, %s1130_s9  ;;  %660 = vrot.lane.b32.xlu1 %v522_v54, %s1117_s21 }
 0x1bc   :  { %903 = vrot.lane.b32.xlu0 %v593_v11, %s1117_s21  ;;  %666 = vrot.lane.b32.xlu1 %v522_v54, %s1130_s9 }
 0x1c0   :  { %909 = vrot.lane.b32.xlu0 %v593_v11, %s1130_s9  ;;  %905 = vrot.lane.b32.xlu1 %v599_v26, %s1117_s21 }
 0x1c4   :  { %670 = vrot.lane.b32.xlu0 %v516_v13, %s1131_s10  ;;  %911 = vrot.lane.b32.xlu1 %v599_v26, %s1130_s9 }
 0x1c8   :  { %915 = vrot.lane.b32.xlu0 %v593_v11, %s1131_s10  ;;  %672 = vrot.lane.b32.xlu1 %v522_v54, %s1131_s10 }
 0x1cc   :  { %676 = vrot.lane.b32.xlu0 %v516_v13, %s1132_s11  ;;  %917 = vrot.lane.b32.xlu1 %v599_v26, %s1131_s10 }
 0x1d0   :  { %921 = vrot.lane.b32.xlu0 %v593_v11, %s1132_s11  ;;  %678 = vrot.lane.b32.xlu1 %v522_v54, %s1132_s11 }
 0x1d4   :  { %652 = vrot.lane.b32.xlu0 %v516_v13, %s1121_s24  ;;  %923 = vrot.lane.b32.xlu1 %v599_v26, %s1132_s11 }
 0x1d8   :  { %682 = vrot.lane.b32.xlu0 %v516_v13, %s1133_s12  ;;  %654 = vrot.lane.b32.xlu1 %v522_v54, %s1121_s24 }
 0x1dc   :  { %897 = vrot.lane.b32.xlu0 %v593_v11, %s1121_s24  ;;  %684 = vrot.lane.b32.xlu1 %v522_v54, %s1133_s12 }
 0x1e0   :  { %927 = vrot.lane.b32.xlu0 %v593_v11, %s1133_s12  ;;  %899 = vrot.lane.b32.xlu1 %v599_v26, %s1121_s24 }
 0x1e4   :  { %929 = vrot.lane.b32.xlu1 %v599_v26, %s1133_s12 }
 0x1ed   :  { %v609_v57 = vpop.permute.xlu0 %608 }
 0x1ee   :  { %v689_v59 = vsel %vm688_vm0, %v1568_v61, %v609_v57 }
 0x1f1   :  { %v611_v58 = vpop.permute.xlu1 %610 }
 0x1f2   :  { %v854_v38 = vpop.permute.xlu0 %853  ;;  %v690_v0 = vsel %vm688_vm0, %v1572_v53, %v611_v58 }
 0x1f3   :  { %v933_v5 = vsel %vm688_vm0, %v1574_v7, %v854_v38 }
 0x1f6   :  { %v856_v60 = vpop.permute.xlu1 %855  ;;  %v615_v39 = vpop.permute.xlu0 %614 }
 0x1f7   :  { %v692_v30 = vsel %vm691_vm1, %v689_v59, %v615_v39  ;;  %v934_v18 = vsel %vm688_vm0, %v1580_v4, %v856_v60 }
 0x1fa   :  { %v617_v10 = vpop.permute.xlu1 %616  ;;  %v860_v14 = vpop.permute.xlu0 %859 }
 0x1fb   :  { %v693_v28 = vsel %vm691_vm1, %v690_v0, %v617_v10  ;;  %v935_v29 = vsel %vm691_vm1, %v933_v5, %v860_v14 }
 0x1fe   :  { %v862_v19 = vpop.permute.xlu1 %861  ;;  %v621_v17 = vpop.permute.xlu0 %620 }
 0x1ff   :  { %v936_v16 = vsel %vm691_vm1, %v934_v18, %v862_v19  ;;  %v695_v20 = vsel %vm694_vm2, %v692_v30, %v621_v17 }
 0x202   :  { %v623_v31 = vpop.permute.xlu1 %622  ;;  %v866_v63 = vpop.permute.xlu0 %865 }
 0x203   :  { %v696_v6 = vsel %vm694_vm2, %v693_v28, %v623_v31  ;;  %v937_v9 = vsel %vm694_vm2, %v935_v29, %v866_v63 }
 0x206   :  { %v868_v15 = vpop.permute.xlu1 %867  ;;  %v627_v32 = vpop.permute.xlu0 %626 }
 0x207   :  { %v938_v33 = vsel %vm694_vm2, %v936_v16, %v868_v15  ;;  %v698_v21 = vsel %vm697_vm3, %v695_v20, %v627_v32 }
 0x20a   :  { %v629_v22 = vpop.permute.xlu1 %628  ;;  %v872_v36 = vpop.permute.xlu0 %871 }
 0x20b   :  { %v699_v37 = vsel %vm697_vm3, %v696_v6, %v629_v22  ;;  %v939_v23 = vsel %vm697_vm3, %v937_v9, %v872_v36 }
 0x20e   :  { %v874_v24 = vpop.permute.xlu1 %873  ;;  %v633_v35 = vpop.permute.xlu0 %632 }
 0x20f   :  { %v1620_v41 = vsel %vm697_vm3, %v938_v33, %v874_v24  ;;  %v701_v11 = vsel %vm700_vm5, %v698_v21, %v633_v35 }
 0x212   :  { %v635_v2 = vpop.permute.xlu1 %634  ;;  %v878_v25 = vpop.permute.xlu0 %877 }
 0x213   :  { %v702_v60 = vsel %vm700_vm5, %v699_v37, %v635_v2  ;;  %v941_v20 = vsel %vm700_vm5, %v939_v23, %v878_v25 }
 0x216   :  { %v1622_v48 = vpop.permute.xlu1 %879  ;;  %v639_v42 = vpop.permute.xlu0 %638 }
 0x217   :  { %v704_v26 = vsel %vm703_vm6, %v701_v11, %v639_v42  ;;  %v942_v24 = vsel %vm700_vm5, %v1620_v41, %v1622_v48 }
 0x21a   :  { %v641_v47 = vpop.permute.xlu1 %640  ;;  %v884_v56 = vpop.permute.xlu0 %883 }
 0x21b   :  { %v705_v5 = vsel %vm703_vm6, %v702_v60, %v641_v47  ;;  %v943_v9 = vsel %vm703_vm6, %v941_v20, %v884_v56 }
 0x21e   :  { %v1624_v43 = vpop.permute.xlu1 %885  ;;  %v645_v55 = vpop.permute.xlu0 %644 }
 0x21f   :  { %v707_v57 = vsel %vm706_vm7, %v704_v26, %v645_v55  ;;  %v944_v42 = vsel %vm703_vm6, %v942_v24, %v1624_v43 }
 0x222   :  { %v647_v44 = vpop.permute.xlu1 %646  ;;  %v890_v3 = vpop.permute.xlu0 %889 }
 0x223   :  { %v708_v14 = vsel %vm706_vm7, %v705_v5, %v647_v44  ;;  %v945_v32 = vsel %vm706_vm7, %v943_v9, %v890_v3 }
 0x226   :  { %v1626_v49 = vpop.permute.xlu1 %891  ;;  %v659_v1 = vpop.permute.xlu0 %658 }
 0x227   :  { %v946_v56 = vsel %vm706_vm7, %v944_v42, %v1626_v49 }
 0x22a   :  { %v661_v50 = vpop.permute.xlu1 %660  ;;  %v665_v34 = vpop.permute.xlu0 %664 }
 0x22b   :  { %v716_v58 = vsel %vm715_vm8, %v659_v1, %v665_v34 }
 0x22e   :  { %v667_v27 = vpop.permute.xlu1 %666  ;;  %v1628_v51 = vpop.permute.xlu0 %903 }
 0x22f   :  { %v717_v28 = vsel %vm715_vm8, %v661_v50, %v667_v27 }
 0x232   :  { %v1630_v52 = vpop.permute.xlu1 %905  ;;  %v910_v40 = vpop.permute.xlu0 %909 }
 0x233   :  { %v951_v33 = vsel %vm715_vm8, %v1628_v51, %v910_v40  ;;  %v1134_v40 = vmov 0  }
 0x234   :  { %1104 = vset.pattern.permute.xlu0 %v1134_v40  ;;  %1103 = vset.pattern.permute.xlu1 %v1134_v40 }
 0x236   :  { %v912_v62 = vpop.permute.xlu1 %911  ;;  %v671_v46 = vpop.permute.xlu0 %670 }
 0x237   :  { %v719_v38 = vsel %vm718_vm9, %v716_v58, %v671_v46  ;;  %v952_v55 = vsel %vm715_vm8, %v1630_v52, %v912_v62  ;;  %v754_v62 = vadd.s32 8, %v1204_v12 }
 0x239   :  { %v756_v46 = vand.u32 1, %v754_v62 }
 0x23a   :  { %v673_v8 = vpop.permute.xlu1 %672  ;;  %v916_v45 = vpop.permute.xlu0 %915 }
 0x23b   :  { %v720_v19 = vsel %vm718_vm9, %v717_v28, %v673_v8  ;;  %v953_v36 = vsel %vm718_vm9, %v951_v33, %v916_v45  ;;  %v755_v8 = vand.u32 1, %v1204_v12  ;;  %vm1706_vm0 = vcmp.eq.s32.totalorder %v756_v46, 0 }
 0x23d   :  { %vm1710_vm1 = vcmp.eq.s32.totalorder %v755_v8, 0 }
 0x23e   :  { %v918_v61 = vpop.permute.xlu1 %917  ;;  %v677_v13 = vpop.permute.xlu0 %676 }
 0x23f   :  { %v722_v39 = vsel %vm721_vm11, %v719_v38, %v677_v13  ;;  %v954_v44 = vsel %vm718_vm9, %v952_v55, %v918_v61 }
 0x242   :  { %v679_v53 = vpop.permute.xlu1 %678  ;;  %v922_v7 = vpop.permute.xlu0 %921 }
 0x243   :  { %v723_v31 = vsel %vm721_vm11, %v720_v19, %v679_v53  ;;  %v955_v35 = vsel %vm721_vm11, %v953_v36, %v922_v7 }
 0x246   :  { %v924_v4 = vpop.permute.xlu1 %923  ;;  %v653_v54 = vpop.permute.xlu0 %652 }
 0x247   :  { %v710_v59 = vsel %vm709_vm10, %v707_v57, %v653_v54 }
 0x248   :  { %v1647_v29 = vsel %vm712_vm13, %v710_v59, %v659_v1  ;;  %v956_v1 = vsel %vm721_vm11, %v954_v44, %v924_v4 }
 0x24a   :  { %v655_v30 = vpop.permute.xlu1 %654  ;;  %v683_v0 = vpop.permute.xlu0 %682 }
 0x24b   :  { %v1642_v10 = vsel %vm724_vm12, %v722_v39, %v683_v0  ;;  %v711_v17 = vsel %vm709_vm10, %v708_v14, %v655_v30 }
 0x24c   :  { %v728_v18 = vsel %vm727_vm15, %v1642_v10, 0.0  ;;  %v1664_v21 = vsel %vm712_vm13, %v711_v17, %v661_v50 }
 0x24d   :  { %v729_v16 = vadd.f32 %v728_v18, %v1647_v29 }
 0x24e   :  { %v685_v63 = vpop.permute.xlu1 %684  ;;  %v898_v6 = vpop.permute.xlu0 %897 }
 0x24f   :  { %v1658_v15 = vsel %vm724_vm12, %v723_v31, %v685_v63  ;;  %730 = vadd.xlane.f32.xlu0 %v729_v16  ;;  %v947_v37 = vsel %vm709_vm10, %v945_v32, %v898_v6 }
 0x250   :  { %v732_v22 = vsel %vm727_vm15, %v1658_v15, 0.0  ;;  %v1686_v41 = vsel %vm712_vm13, %v947_v37, %v1628_v51 }
 0x251   :  { %v733_v23 = vadd.f32 %v732_v22, %v1664_v21 }
 0x252   :  { %v900_v2 = vpop.permute.xlu1 %899  ;;  %v928_v25 = vpop.permute.xlu0 %927 }
 0x253   :  { %v1678_v47 = vsel %vm724_vm12, %v955_v35, %v928_v25  ;;  %734 = vadd.xlane.f32.xlu1 %v733_v23  ;;  %v948_v43 = vsel %vm709_vm10, %v946_v56, %v900_v2 }
 0x254   :  { %v959_v48 = vsel %vm727_vm15, %v1678_v47, 0.0  ;;  %v1699_v34 = vsel %vm712_vm13, %v948_v43, %v1630_v52 }
 0x255   :  { %v960_v3 = vadd.f32 %v959_v48, %v1686_v41 }
 0x256   :  { %v930_v50 = vpop.permute.xlu1 %929 }
 0x257   :  { %v1695_v49 = vsel %vm724_vm12, %v956_v1, %v930_v50  ;;  %961 = vadd.xlane.f32.xlu0 %v960_v3 }
 0x258   :  { %v963_v27 = vsel %vm727_vm15, %v1695_v49, 0.0 }
 0x259   :  { %v964_v51 = vadd.f32 %v963_v27, %v1699_v34 }
 0x25b   :  { %965 = vadd.xlane.f32.xlu0 %v964_v51 }
 0x2d8   :  { %v731_v45 = vpop.xlane.xlu0 %730 }
 0x2d9   :  { %v740_v53 = vrot.slane %v731_v45, 7  ;;  %v745_v7 = vrot.slane %v731_v45, 1 }
 0x2dc   :  { %v735_v52 = vpop.xlane.xlu1 %734 }
 0x2dd   :  { %v737_v11 = vrot.slane %v735_v52, 7  ;;  %v746_v4 = vrot.slane %v735_v52, 1 }
 0x2df   :  { %v741_v54 = vsel %vm141_vm4, %v740_v53, %v737_v11  ;;  %v751_v26 = vsel %vm159_vm14, %v746_v4, %v745_v7  ;;  %v744_v12 = vsel %vm141_vm4, %v737_v11, %v740_v53  ;;  %v747_v57 = vsel %vm159_vm14, %v745_v7, %v746_v4 }
 0x2e0   :  { %v760_v58 = vsel %vm1706_vm0, %v751_v26, %v741_v54  ;;  %v962_v38 = vpop.xlane.xlu0 %961  ;;  %v759_v59 = vsel %vm1710_vm1, %v747_v57, %v744_v12 }
 0x2e1   :  { %v762_v60 = vadd.f32 %v760_v58, %v735_v52  ;;  %v761_v39 = vadd.f32 %v759_v59, %v731_v45  ;;  %v971_v14 = vrot.slane %v962_v38, 7  ;;  %v976_v28 = vrot.slane %v962_v38, 1 }
 0x2e3   :  { %v763_v30 = vmul.f32 0.0025510204, %v761_v39  ;;  %v764_v0 = vmul.f32 0.0025510204, %v762_v60 }
 0x2e4   :  { %v966_v5 = vpop.xlane.xlu0 %965 }
 0x2e5   :  { %v968_v18 = vrot.slane %v966_v5, 7  ;;  %v977_v19 = vrot.slane %v966_v5, 1  ;;  %767 = vperm.xlu1 %1103, %v763_v30   ;;  %772 = vperm.xlu0 %1104, %v764_v0  }
 0x2e7   :  { %v972_v17 = vsel %vm141_vm4, %v971_v14, %v968_v18  ;;  %v982_v16 = vsel %vm159_vm14, %v977_v19, %v976_v28  ;;  %v975_v20 = vsel %vm141_vm4, %v968_v18, %v971_v14  ;;  %v978_v31 = vsel %vm159_vm14, %v976_v28, %v977_v19 }
 0x2e8   :  { %v984_v63 = vsel %vm1706_vm0, %v982_v16, %v972_v17  ;;  %v983_v6 = vsel %vm1710_vm1, %v978_v31, %v975_v20 }
 0x2e9   :  { %v985_v9 = vadd.f32 %v983_v6, %v962_v38  ;;  %v986_v32 = vadd.f32 %v984_v63, %v966_v5 }
 0x2eb   :  { %v987_v33 = vmul.f32 0.0025510204, %v985_v9  ;;  %v988_v22 = vmul.f32 0.0025510204, %v986_v32 }
 0x2ed   :  { %991 = vperm.xlu1 %1103, %v987_v33  }
 0x2f1   :  { %996 = vperm.xlu1 %1103, %v988_v22  }
 0x360   :  { %v768_v36 = vpop.permute.xlu1 %767  ;;  %v773_v37 = vpop.permute.xlu0 %772 }
 0x361   :  { %v1731_v23 = vsub.f32 %v1647_v29, %v768_v36  ;;  %v1734_v24 = vsub.f32 %v1642_v10, %v768_v36  ;;  %v1737_v35 = vsub.f32 %v1664_v21, %v773_v37  ;;  %v1740_v2 = vsub.f32 %v1658_v15, %v773_v37 }
 0x363   :  { %v780_v25 = vmul.f32 %v1734_v24, %v1734_v24  ;;  %v782_v42 = vmul.f32 %v1740_v2, %v1740_v2  ;;  %v779_v56 = vmul.f32 %v1731_v23, %v1731_v23  ;;  %v781_v29 = vmul.f32 %v1737_v35, %v1737_v35 }
 0x365   :  { %v783_v10 = vsel %vm727_vm15, %v780_v25, 0.0  ;;  %v787_v21 = vsel %vm727_vm15, %v782_v42, 0.0  ;;  %v602_v25 = vld [vmem:[%s1840_s2] sm:$0xff]  ;;  %v603_v42 = vld [vmem:[%s1840_s2 + $0x8] sm:$0xff] }
 0x366   :  { %v784_v55 = vadd.f32 %v783_v10, %v779_v56  ;;  %v788_v48 = vadd.f32 %v787_v21, %v781_v29  ;;  %v604_v10 = vld [vmem:[%s1841_s3] sm:$0xff]  ;;  %v605_v21 = vld [vmem:[%s1841_s3 + $0x8] sm:$0xff] }
 0x368   :  { %v992_v15 = vpop.permute.xlu1 %991  ;;  %785 = vadd.xlane.f32.xlu1 %v784_v55  ;;  %789 = vadd.xlane.f32.xlu0 %v788_v48 }
 0x369   :  { %v1753_v44 = vsub.f32 %v1686_v41, %v992_v15  ;;  %v1756_v43 = vsub.f32 %v1678_v47, %v992_v15 }
 0x36b   :  { %v1004_v3 = vmul.f32 %v1756_v43, %v1756_v43  ;;  %v1003_v1 = vmul.f32 %v1753_v44, %v1753_v44 }
 0x36c   :  { %v997_v50 = vpop.permute.xlu1 %996 }
 0x36d   :  { %v1763_v27 = vsub.f32 %v1699_v34, %v997_v50  ;;  %v1766_v51 = vsub.f32 %v1695_v49, %v997_v50  ;;  %v1007_v40 = vsel %vm727_vm15, %v1004_v3, 0.0 }
 0x36e   :  { %v1008_v41 = vadd.f32 %v1007_v40, %v1003_v1 }
 0x36f   :  { %v1006_v47 = vmul.f32 %v1766_v51, %v1766_v51  ;;  %v1005_v62 = vmul.f32 %v1763_v27, %v1763_v27 }
 0x370   :  { %1009 = vadd.xlane.f32.xlu1 %v1008_v41 }
 0x371   :  { %v1011_v46 = vsel %vm727_vm15, %v1006_v47, 0.0 }
 0x372   :  { %v1012_v8 = vadd.f32 %v1011_v46, %v1005_v62 }
 0x374   :  { %1013 = vadd.xlane.f32.xlu1 %v1012_v8 }
 0x3f1   :  { %v786_v45 = vpop.xlane.xlu1 %785  ;;  %v790_v34 = vpop.xlane.xlu0 %789 }
 0x3f2   :  { %v795_v52 = vrot.slane %v786_v45, 7  ;;  %v800_v53 = vrot.slane %v786_v45, 1  ;;  %v792_v49 = vrot.slane %v790_v34, 7  ;;  %v801_v7 = vrot.slane %v790_v34, 1 }
 0x3f4   :  { %v796_v11 = vsel %vm141_vm4, %v795_v52, %v792_v49  ;;  %v799_v4 = vsel %vm141_vm4, %v792_v49, %v795_v52  ;;  %v802_v54 = vsel %vm159_vm14, %v800_v53, %v801_v7  ;;  %v806_v26 = vsel %vm159_vm14, %v801_v7, %v800_v53 }
 0x3f5   :  { %v807_v12 = vsel %vm1710_vm1, %v802_v54, %v799_v4  ;;  %v808_v57 = vsel %vm1706_vm0, %v806_v26, %v796_v11 }
 0x3f6   :  { %v809_v58 = vadd.f32 %v807_v12, %v786_v45  ;;  %v810_v38 = vadd.f32 %v808_v57, %v790_v34 }
 0x3f8   :  { %v811_v59 = vmul.f32 0.0025510204, %v809_v58  ;;  %v812_v60 = vmul.f32 0.0025510204, %v810_v38 }
 0x3f9   :  { %v1010_v39 = vpop.xlane.xlu1 %1009 }
 0x3fa   :  { %v813_v30 = vadd.f32 1e-05, %v811_v59  ;;  %v814_v0 = vadd.f32 1e-05, %v812_v60  ;;  %v1019_v14 = vrot.slane %v1010_v39, 7  ;;  %v1024_v28 = vrot.slane %v1010_v39, 1 }
 0x3fc   :  { %1107 = vrsqrt.f32 %v813_v30 }
 0x3fd   :  { %1109 = vrsqrt.f32 %v814_v0  ;;  %v1014_v5 = vpop.xlane.xlu1 %1013 }
 0x3fe   :  { %v1016_v18 = vrot.slane %v1014_v5, 7  ;;  %v1025_v19 = vrot.slane %v1014_v5, 1 }
 0x400   :  { %v1020_v17 = vsel %vm141_vm4, %v1019_v14, %v1016_v18  ;;  %v1023_v16 = vsel %vm141_vm4, %v1016_v18, %v1019_v14  ;;  %v1026_v20 = vsel %vm159_vm14, %v1024_v28, %v1025_v19  ;;  %v1030_v31 = vsel %vm159_vm14, %v1025_v19, %v1024_v28 }
 0x401   :  { %v1031_v63 = vsel %vm1710_vm1, %v1026_v20, %v1023_v16  ;;  %v1032_v6 = vsel %vm1706_vm0, %v1030_v31, %v1020_v17 }
 0x402   :  { %v1033_v9 = vadd.f32 %v1031_v63, %v1010_v39  ;;  %v1034_v32 = vadd.f32 %v1032_v6, %v1014_v5 }
 0x404   :  { %v1035_v33 = vmul.f32 0.0025510204, %v1033_v9  ;;  %v1036_v22 = vmul.f32 0.0025510204, %v1034_v32 }
 0x406   :  { %v1037_v36 = vadd.f32 1e-05, %v1035_v33  ;;  %v1038_v37 = vadd.f32 1e-05, %v1036_v22 }
 0x408   :  { %1111 = vrsqrt.f32 %v1037_v36 }
 0x409   :  { %v1108_v13 = vpop.eup %1107  ;;  %1113 = vrsqrt.f32 %v1038_v37 }
 0x40a   :  { %v1110_v56 = vpop.eup %1109  ;;  %v817_v61 = vmul.f32 %v1108_v13, %v602_v25 }
 0x40b   :  { %v818_v29 = vmul.f32 %v1110_v56, %v603_v42 }
 0x40c   :  { %821 = vperm.xlu1 %1103, %v817_v61  }
 0x40d   :  { %826 = vperm.xlu0 %1104, %v818_v29  }
 0x410   :  { %835 = vperm.xlu1 %1103, %v604_v10  }
 0x414   :  { %840 = vperm.xlu1 %1103, %v605_v21  }
 0x415   :  { %v1112_v55 = vpop.eup %1111 }
 0x416   :  { %v1041_v48 = vmul.f32 %v1112_v55, %v602_v25  ;;  %v1114_v15 = vpop.eup %1113 }
 0x417   :  { %v1042_v3 = vmul.f32 %v1114_v15, %v603_v42 }
 0x418   :  { %1045 = vperm.xlu1 %1103, %v1041_v48  }
 0x41c   :  { %1050 = vperm.xlu1 %1103, %v1042_v3  }
 0x487   :  { %v822_v1 = vpop.permute.xlu1 %821 }
 0x488   :  { %v829_v50 = vmul.f32 %v822_v1, %v1731_v23  ;;  %v830_v40 = vmul.f32 %v822_v1, %v1734_v24  ;;  %v827_v41 = vpop.permute.xlu0 %826 }
 0x489   :  { %v831_v8 = vmul.f32 %v827_v41, %v1737_v35  ;;  %v832_v45 = vmul.f32 %v827_v41, %v1740_v2 }
 0x48b   :  { %v836_v47 = vpop.permute.xlu1 %835 }
 0x48c   :  { %v843_v62 = vadd.f32 %v836_v47, %v829_v50  ;;  %v844_v46 = vadd.f32 %v836_v47, %v830_v40 }
 0x48e   :  { %847 = vst [vmem:[%s1842_s4] sm:$0xff] %v843_v62  ;;  %848 = vst.msk [vmem:[%s1842_s4 + $0x8] sm:$0xff] %vm727_vm15, %v844_v46 }
 0x48f   :  { %v841_v23 = vpop.permute.xlu1 %840 }
 0x490   :  { %v845_v34 = vadd.f32 %v841_v23, %v831_v8  ;;  %v846_v24 = vadd.f32 %v841_v23, %v832_v45 }
 0x492   :  { %849 = vst [vmem:[%s1842_s4 + $0x10] sm:$0xff] %v845_v34  ;;  %850 = vst.msk [vmem:[%s1842_s4 + $0x18] sm:$0xff] %vm727_vm15, %v846_v24 }
 0x493   :  { %v1046_v35 = vpop.permute.xlu1 %1045 }
 0x494   :  { %v1053_v2 = vmul.f32 %v1046_v35, %v1753_v44  ;;  %v1054_v52 = vmul.f32 %v1046_v35, %v1756_v43 }
 0x496   :  { %v1057_v53 = vadd.f32 %v1053_v2, %v836_v47  ;;  %v1058_v49 = vadd.f32 %v1054_v52, %v836_v47 }
 0x497   :  { %v1051_v7 = vpop.permute.xlu1 %1050 }
 0x498   :  { %1079 = vst [vmem:[%s1842_s4 + $0x20] sm:$0xff] %v1057_v53  ;;  %1080 = vst.msk [vmem:[%s1842_s4 + $0x28] sm:$0xff] %vm727_vm15, %v1058_v49  ;;  %v1055_v11 = vmul.f32 %v1051_v7, %v1763_v27  ;;  %v1056_v4 = vmul.f32 %v1051_v7, %v1766_v51 }
 0x49a   :  { %v1059_v54 = vadd.f32 %v1055_v11, %v841_v23  ;;  %v1060_v44 = vadd.f32 %v1056_v4, %v841_v23 }
 0x49c   :  { %1081 = vst [vmem:[%s1842_s4 + $0x30] sm:$0xff] %v1059_v54  ;;  %1082 = vst.msk [vmem:[%s1842_s4 + $0x38] sm:$0xff] %vm727_vm15, %v1060_v44 }

</bundles_post_ra>
